<compile_context>
chip_gen: v7x
topology: tpu7x:2x2x1
jax: 0.10.0
libtpu: 0.0.40
codegen_flags: <defaults>
</compile_context>

<pallas_src>
import functools
import math

import jax
import jax.numpy as jnp
import numpy as np
from jax.experimental import pallas as pl
from jax.experimental.pallas import tpu as pltpu

LN_EPS = 1e-5


def _layer_norm(v, scale, shift):
    # torch.nn.LayerNorm semantics: biased variance over the last axis (f32).
    mean = jnp.mean(v, axis=-1, keepdims=True)
    var = jnp.mean((v - mean) ** 2, axis=-1, keepdims=True)
    return (v - mean) * jax.lax.rsqrt(var + LN_EPS) * scale + shift


def _gelu_tanh(v):
    # tanh-approximated GELU (tanh lowers to the EUP on TPU).
    c = math.sqrt(2.0 / math.pi)
    return 0.5 * v * (1.0 + jnp.tanh(c * (v + 0.044715 * v * v * v)))


def _dot_nt(a, b):
    # a (m, k) @ b(n, k)^T -> (m, n), f32 accumulation on the MXU.
    return jax.lax.dot_general(a, b, (((1,), (1,)), ((), ())),
                               preferred_element_type=jnp.float32)


def decoder_block_kernel(xq_ref, xkv_ref, wq_ref, wk_ref, wv_ref, wo_ref,
                         bo_ref, n1s_ref, n1b_ref, wg_ref, wu_ref, wd_ref,
                         n2s_ref, n2b_ref, o_ref, *, num_heads):
    qi = pl.program_id(1)

    xq = xq_ref[0]                 # (TQ, D) f32 — query rows for this block
    xkv = xkv_ref[0]               # (S,  D) f32 — full sequence for K/V
    tq, d = xq.shape
    s = xkv.shape[0]
    hd = d // num_heads
    inv_sqrt_hd = 1.0 / math.sqrt(hd)

    n1s = n1s_ref[...]             # (1, D) f32, broadcast over rows
    n1b = n1b_ref[...]
    n2s = n2s_ref[...]
    n2b = n2b_ref[...]

    # -------- res = norm1(x)  (f32) --------
    res1 = _layer_norm(xq, n1s, n1b)

    # -------- causal multi-head self-attention --------
    xq_bf = xq.astype(jnp.bfloat16)
    xkv_bf = xkv.astype(jnp.bfloat16)

    q = jnp.dot(xq_bf, wq_ref[...], preferred_element_type=jnp.float32)   # (TQ, D)
    k = jnp.dot(xkv_bf, wk_ref[...], preferred_element_type=jnp.float32)  # (S, D)
    v = jnp.dot(xkv_bf, wv_ref[...], preferred_element_type=jnp.float32)  # (S, D)

    # additive causal bias (f32), built once for all heads; global row offset
    row = qi * tq + jax.lax.broadcasted_iota(jnp.int32, (tq, s), 0)
    col = jax.lax.broadcasted_iota(jnp.int32, (tq, s), 1)
    bias = jnp.where(col <= row, 0.0, -1e30).astype(jnp.float32)

    q_bf = q.astype(jnp.bfloat16)
    k_bf = k.astype(jnp.bfloat16)
    v_bf = v.astype(jnp.bfloat16)
    wo = wo_ref[...]               # (D, D) bf16

    attn = jnp.zeros((tq, d), jnp.float32)
    # TODO(synk): for head_dim >= 128, batch heads into a single (H, TQ, hd)
    # einsum (bigger MXU tiles on v6e/v7x) instead of this unrolled loop.
    for h in range(num_heads):
        lo, hi = h * hd, (h + 1) * hd
        sc = _dot_nt(q_bf[:, lo:hi], k_bf[:, lo:hi])          # (TQ, S) f32
        sc = sc * inv_sqrt_hd + bias
        m = jnp.max(sc, axis=-1, keepdims=True)
        p = jnp.exp(sc - m)
        p = p * pl.reciprocal(jnp.sum(p, axis=-1, keepdims=True), approx=True)
        # TODO(synk): attention dropout (rate=0.5) is identity in eval mode.
        ctx_h = jnp.dot(p.astype(jnp.bfloat16), v_bf[:, lo:hi],
                        preferred_element_type=jnp.float32)    # (TQ, hd)
        # fold this head straight into the output projection accumulator
        attn = attn + jnp.dot(ctx_h.astype(jnp.bfloat16), wo[lo:hi, :],
                              preferred_element_type=jnp.float32)
    attn = attn + bo_ref[...]

    # -------- x = norm1(attn) + res --------
    x1 = _layer_norm(attn, n1s, n1b) + res1

    # -------- res = norm2(x) --------
    res2 = _layer_norm(x1, n2s, n2b)

    # -------- gated-GELU MLP: down( gelu(gate(x)) * up(x) ) --------
    x1_bf = x1.astype(jnp.bfloat16)
    gate = _gelu_tanh(jnp.dot(x1_bf, wg_ref[...],
                              preferred_element_type=jnp.float32))
    up = jnp.dot(x1_bf, wu_ref[...], preferred_element_type=jnp.float32)
    mlp = jnp.dot((gate * up).astype(jnp.bfloat16), wd_ref[...],
                  preferred_element_type=jnp.float32)

    # -------- x = norm2(mlp) + res --------
    out = _layer_norm(mlp, n2s, n2b) + res2
    o_ref[0] = out.astype(o_ref.dtype)


def usta_decoder_block(x, params, num_heads, block_q=None):
    B, S, D = x.shape
    if block_q is None:
        block_q = S
    assert S % block_q == 0 and (block_q % 8 == 0 or block_q == S)
    nq = S // block_q

    weight_order = ("wq", "wk", "wv", "wo", "bo",
                    "n1_scale", "n1_shift",
                    "wg", "wu", "wd",
                    "n2_scale", "n2_shift")
    weights = [params[n] for n in weight_order]

    # grid-invariant params: whole-array VMEM residents, no double-buffering
    def weight_spec():
        return pl.BlockSpec(memory_space=pltpu.MemorySpace.VMEM)

    flops = int(B * (14 * S * D * D + 4 * S * S * D))
    transcendentals = int(B * (num_heads * S * S + S * D))
    bytes_accessed = int(sum(int(w.size) * w.dtype.itemsize for w in weights)
                         + 3 * B * S * D * 4)

    return pl.pallas_call(
        functools.partial(decoder_block_kernel, num_heads=num_heads),
        out_shape=jax.ShapeDtypeStruct((B, S, D), jnp.float32),
        grid_spec=pltpu.PrefetchScalarGridSpec(
            num_scalar_prefetch=0,
            grid=(B, nq),
            in_specs=[pl.BlockSpec((1, block_q, D), lambda b, qi: (b, qi, 0)),
                      pl.BlockSpec((1, S, D), lambda b, qi: (b, 0, 0))]
                     + [weight_spec() for _ in weights],
            out_specs=pl.BlockSpec((1, block_q, D), lambda b, qi: (b, qi, 0)),
        ),
        compiler_params=pltpu.CompilerParams(
            dimension_semantics=("parallel", "parallel"),
            # raise above the v5e 16 MiB default; stays within v7x scoped VMEM
            vmem_limit_bytes=32 * 1024 * 1024),
        cost_estimate=pl.CostEstimate(flops=flops,
                                      transcendentals=transcendentals,
                                      bytes_accessed=bytes_accessed),
    )(x, x, *weights)


def init_params(key, embedding_dim):
    D = embedding_dim
    std = 0.02
    ks = jax.random.split(key, 8)

    def w(k):  # matmul weights stored in bf16 (halves DMA + VMEM residency)
        return (jax.random.normal(k, (D, D), jnp.float32) * std).astype(jnp.bfloat16)

    return {
        # attention projections stored as (in, out) so the kernel does x @ W
        "wq": w(ks[0]), "wk": w(ks[1]), "wv": w(ks[2]), "wo": w(ks[3]),
        "bo": jax.random.normal(ks[4], (1, D), jnp.float32) * std,
        "n1_scale": jnp.ones((1, D), jnp.float32),
        "n1_shift": jnp.zeros((1, D), jnp.float32),
        "wg": w(ks[5]), "wu": w(ks[6]), "wd": w(ks[7]),
        "n2_scale": jnp.ones((1, D), jnp.float32),
        "n2_shift": jnp.zeros((1, D), jnp.float32),
    }


def reference_block(x, params, num_heads):
    """Pure-JAX f32 reference mirroring the PyTorch forward (same params)."""
    p = {k: v.astype(jnp.float32) for k, v in params.items()}
    B, S, D = x.shape
    hd = D // num_heads

    def ln(v, s, b):
        m = jnp.mean(v, -1, keepdims=True)
        var = jnp.mean((v - m) ** 2, -1, keepdims=True)
        return (v - m) / jnp.sqrt(var + LN_EPS) * s + b

    res = ln(x, p["n1_scale"], p["n1_shift"])
    q = x @ p["wq"]
    k = x @ p["wk"]
    v = x @ p["wv"]
    q = q.reshape(B, S, num_heads, hd).transpose(0, 2, 1, 3)
    k = k.reshape(B, S, num_heads, hd).transpose(0, 2, 1, 3)
    v = v.reshape(B, S, num_heads, hd).transpose(0, 2, 1, 3)
    scores = jnp.einsum("bhqd,bhkd->bhqk", q, k) / math.sqrt(hd)
    mask = jnp.tril(jnp.ones((S, S), bool))
    scores = jnp.where(mask, scores, -1e30)
    attn = jax.nn.softmax(scores, axis=-1)
    ctx = jnp.einsum("bhqk,bhkd->bhqd", attn, v).transpose(0, 2, 1, 3).reshape(B, S, D)
    xa = ctx @ p["wo"] + p["bo"]
    x1 = ln(xa, p["n1_scale"], p["n1_shift"]) + res
    res2 = ln(x1, p["n2_scale"], p["n2_shift"])
    g = x1 @ p["wg"]
    c = math.sqrt(2.0 / math.pi)
    gate = 0.5 * g * (1.0 + jnp.tanh(c * (g + 0.044715 * g ** 3)))
    mlp = (gate * (x1 @ p["wu"])) @ p["wd"]
    return ln(mlp, p["n2_scale"], p["n2_shift"]) + res2


if __name__ == "__main__":
    batch, seq, embedding_dim, num_heads = 2, 16, 64, 4
    key = jax.random.PRNGKey(0)
    kx, kp = jax.random.split(key)
    x = jax.random.normal(kx, (batch, seq, embedding_dim), jnp.float32)
    params = init_params(kp, embedding_dim)

    out = usta_decoder_block(x, params, num_heads, block_q=8)
    out = jax.block_until_ready(out)

    ref = reference_block(x, params, num_heads)
    # bf16 matmul operands (f32 accumulation) -> slightly looser tolerance
    np.testing.assert_allclose(np.asarray(out), np.asarray(ref),
                               rtol=2e-2, atol=2e-2)
    print("KERNEL_OK")
</pallas_src>

<mosaic_0001>
module attributes {stable_mosaic.version = 11 : i64} {
  func.func @decoder_block_kernel(%arg0: i32, %arg1: i32, %arg2: memref<1x8x64xf32, #tpu.memory_space<vmem>>, %arg3: memref<1x16x64xf32, #tpu.memory_space<vmem>>, %arg4: memref<64x64xbf16, #tpu.memory_space<vmem>>, %arg5: memref<64x64xbf16, #tpu.memory_space<vmem>>, %arg6: memref<64x64xbf16, #tpu.memory_space<vmem>>, %arg7: memref<64x64xbf16, #tpu.memory_space<vmem>>, %arg8: memref<1x64xf32, #tpu.memory_space<vmem>>, %arg9: memref<1x64xf32, #tpu.memory_space<vmem>>, %arg10: memref<1x64xf32, #tpu.memory_space<vmem>>, %arg11: memref<64x64xbf16, #tpu.memory_space<vmem>>, %arg12: memref<64x64xbf16, #tpu.memory_space<vmem>>, %arg13: memref<64x64xbf16, #tpu.memory_space<vmem>>, %arg14: memref<1x64xf32, #tpu.memory_space<vmem>>, %arg15: memref<1x64xf32, #tpu.memory_space<vmem>>, %arg16: memref<1x8x64xf32, #tpu.memory_space<vmem>>) attributes {dimension_semantics = [#tpu.dimension_semantics<parallel>, #tpu.dimension_semantics<parallel>], iteration_bounds = array<i64: 2, 2>, scalar_prefetch = 0 : i64, scratch_operands = 0 : i64, tpu.core_type = #tpu.core_type<tc>, window_params = [{transform_indices = @transform_0, window_bounds = array<i64: 1, 8, 64>}, {transform_indices = @transform_1, window_bounds = array<i64: 1, 16, 64>}, {pipeline_mode = #tpu.pipeline_mode<synchronous>, transform_indices = @transform_2, window_bounds = array<i64: 64, 64>}, {pipeline_mode = #tpu.pipeline_mode<synchronous>, transform_indices = @transform_3, window_bounds = array<i64: 64, 64>}, {pipeline_mode = #tpu.pipeline_mode<synchronous>, transform_indices = @transform_4, window_bounds = array<i64: 64, 64>}, {pipeline_mode = #tpu.pipeline_mode<synchronous>, transform_indices = @transform_5, window_bounds = array<i64: 64, 64>}, {pipeline_mode = #tpu.pipeline_mode<synchronous>, transform_indices = @transform_6, window_bounds = array<i64: 1, 64>}, {pipeline_mode = #tpu.pipeline_mode<synchronous>, transform_indices = @transform_7, window_bounds = array<i64: 1, 64>}, {pipeline_mode = #tpu.pipeline_mode<synchronous>, transform_indices = @transform_8, window_bounds = array<i64: 1, 64>}, {pipeline_mode = #tpu.pipeline_mode<synchronous>, transform_indices = @transform_9, window_bounds = array<i64: 64, 64>}, {pipeline_mode = #tpu.pipeline_mode<synchronous>, transform_indices = @transform_10, window_bounds = array<i64: 64, 64>}, {pipeline_mode = #tpu.pipeline_mode<synchronous>, transform_indices = @transform_11, window_bounds = array<i64: 64, 64>}, {pipeline_mode = #tpu.pipeline_mode<synchronous>, transform_indices = @transform_12, window_bounds = array<i64: 1, 64>}, {pipeline_mode = #tpu.pipeline_mode<synchronous>, transform_indices = @transform_13, window_bounds = array<i64: 1, 64>}, {transform_indices = @transform_14, window_bounds = array<i64: 1, 8, 64>}]} {
    %c0 = arith.constant 0 : index
    %c0_0 = arith.constant 0 : index
    %c0_1 = arith.constant 0 : index
    %0 = vector.load %arg2[%c0, %c0_0, %c0_1] : memref<1x8x64xf32, #tpu.memory_space<vmem>>, vector<1x8x64xf32>
    %1 = vector.shape_cast %0 : vector<1x8x64xf32> to vector<8x64xf32>
    %c0_2 = arith.constant 0 : index
    %c0_3 = arith.constant 0 : index
    %c0_4 = arith.constant 0 : index
    %2 = vector.load %arg3[%c0_2, %c0_3, %c0_4] : memref<1x16x64xf32, #tpu.memory_space<vmem>>, vector<1x16x64xf32>
    %3 = vector.shape_cast %2 : vector<1x16x64xf32> to vector<16x64xf32>
    %c0_5 = arith.constant 0 : index
    %c0_6 = arith.constant 0 : index
    %4 = vector.load %arg9[%c0_5, %c0_6] : memref<1x64xf32, #tpu.memory_space<vmem>>, vector<1x64xf32>
    %c0_7 = arith.constant 0 : index
    %c0_8 = arith.constant 0 : index
    %5 = vector.load %arg10[%c0_7, %c0_8] : memref<1x64xf32, #tpu.memory_space<vmem>>, vector<1x64xf32>
    %c0_9 = arith.constant 0 : index
    %c0_10 = arith.constant 0 : index
    %6 = vector.load %arg14[%c0_9, %c0_10] : memref<1x64xf32, #tpu.memory_space<vmem>>, vector<1x64xf32>
    %c0_11 = arith.constant 0 : index
    %c0_12 = arith.constant 0 : index
    %7 = vector.load %arg15[%c0_11, %c0_12] : memref<1x64xf32, #tpu.memory_space<vmem>>, vector<1x64xf32>
    %cst = arith.constant dense<0.000000e+00> : vector<8xf32>
    %8 = vector.multi_reduction <add>, %1, %cst [1] : vector<8x64xf32> to vector<8xf32>
    %9 = vector.shape_cast %8 : vector<8xf32> to vector<8x1xf32>
    %cst_13 = arith.constant 6.400000e+01 : f32
    %10 = vector.broadcast %cst_13 : f32 to vector<8x1xf32>
    %11 = arith.divf %9, %10 : vector<8x1xf32>
    %12 = vector.broadcast %11 : vector<8x1xf32> to vector<8x64xf32>
    %13 = arith.subf %1, %12 : vector<8x64xf32>
    %14 = arith.mulf %13, %13 : vector<8x64xf32>
    %cst_14 = arith.constant dense<0.000000e+00> : vector<8xf32>
    %15 = vector.multi_reduction <add>, %14, %cst_14 [1] : vector<8x64xf32> to vector<8xf32>
    %16 = vector.shape_cast %15 : vector<8xf32> to vector<8x1xf32>
    %cst_15 = arith.constant 6.400000e+01 : f32
    %17 = vector.broadcast %cst_15 : f32 to vector<8x1xf32>
    %18 = arith.divf %16, %17 : vector<8x1xf32>
    %19 = vector.broadcast %11 : vector<8x1xf32> to vector<8x64xf32>
    %20 = arith.subf %1, %19 : vector<8x64xf32>
    %cst_16 = arith.constant 9.99999974E-6 : f32
    %21 = vector.broadcast %cst_16 : f32 to vector<8x1xf32>
    %22 = arith.addf %18, %21 : vector<8x1xf32>
    %23 = math.rsqrt %22 : vector<8x1xf32>
    %24 = vector.broadcast %23 : vector<8x1xf32> to vector<8x64xf32>
    %25 = arith.mulf %20, %24 : vector<8x64xf32>
    %26 = vector.broadcast %4 : vector<1x64xf32> to vector<8x64xf32>
    %27 = arith.mulf %25, %26 : vector<8x64xf32>
    %28 = vector.broadcast %5 : vector<1x64xf32> to vector<8x64xf32>
    %29 = arith.addf %27, %28 : vector<8x64xf32>
    %30 = arith.truncf %1 : vector<8x64xf32> to vector<8x64xbf16>
    %31 = arith.truncf %3 : vector<16x64xf32> to vector<16x64xbf16>
    %c0_17 = arith.constant 0 : index
    %c0_18 = arith.constant 0 : index
    %32 = vector.load %arg4[%c0_17, %c0_18] : memref<64x64xbf16, #tpu.memory_space<vmem>>, vector<64x64xbf16>
    %cst_19 = arith.constant dense<0.000000e+00> : vector<8x64xf32>
    %33 = tpu.matmul %30, %32, %cst_19 {dimension_numbers = #tpu.dot_dimension_numbers<[1], [0], [0], [1], [0, 0, 1, 1], [], []>} : vector<8x64xbf16>, vector<64x64xbf16>, vector<8x64xf32> -> vector<8x64xf32>
    %c0_20 = arith.constant 0 : index
    %c0_21 = arith.constant 0 : index
    %34 = vector.load %arg5[%c0_20, %c0_21] : memref<64x64xbf16, #tpu.memory_space<vmem>>, vector<64x64xbf16>
    %cst_22 = arith.constant dense<0.000000e+00> : vector<16x64xf32>
    %35 = tpu.matmul %31, %34, %cst_22 {dimension_numbers = #tpu.dot_dimension_numbers<[1], [0], [0], [1], [0, 0, 1, 1], [], []>} : vector<16x64xbf16>, vector<64x64xbf16>, vector<16x64xf32> -> vector<16x64xf32>
    %c0_23 = arith.constant 0 : index
    %c0_24 = arith.constant 0 : index
    %36 = vector.load %arg6[%c0_23, %c0_24] : memref<64x64xbf16, #tpu.memory_space<vmem>>, vector<64x64xbf16>
    %cst_25 = arith.constant dense<0.000000e+00> : vector<16x64xf32>
    %37 = tpu.matmul %31, %36, %cst_25 {dimension_numbers = #tpu.dot_dimension_numbers<[1], [0], [0], [1], [0, 0, 1, 1], [], []>} : vector<16x64xbf16>, vector<64x64xbf16>, vector<16x64xf32> -> vector<16x64xf32>
    %c8_i32 = arith.constant 8 : i32
    %38 = arith.muli %arg1, %c8_i32 : i32
    %39 = tpu.iota {dimensions = array<i32: 0>} : vector<8x16xi32>
    %40 = vector.broadcast %38 : i32 to vector<8x16xi32>
    %41 = arith.addi %40, %39 : vector<8x16xi32>
    %42 = tpu.iota {dimensions = array<i32: 1>} : vector<8x16xi32>
    %43 = arith.cmpi sle, %42, %41 : vector<8x16xi32>
    %cst_26 = arith.constant 0.000000e+00 : f32
    %cst_27 = arith.constant -1.000000e+30 : f32
    %44 = vector.broadcast %cst_26 : f32 to vector<8x16xf32>
    %45 = vector.broadcast %cst_27 : f32 to vector<8x16xf32>
    %46 = arith.select %43, %44, %45 : vector<8x16xi1>, vector<8x16xf32>
    %47 = arith.truncf %33 : vector<8x64xf32> to vector<8x64xbf16>
    %48 = arith.truncf %35 : vector<16x64xf32> to vector<16x64xbf16>
    %49 = arith.truncf %37 : vector<16x64xf32> to vector<16x64xbf16>
    %c0_28 = arith.constant 0 : index
    %c0_29 = arith.constant 0 : index
    %50 = vector.load %arg7[%c0_28, %c0_29] : memref<64x64xbf16, #tpu.memory_space<vmem>>, vector<64x64xbf16>
    %cst_30 = arith.constant 0.000000e+00 : f32
    %51 = vector.broadcast %cst_30 : f32 to vector<8x64xf32>
    %52 = vector.extract_strided_slice %47 {offsets = [0, 0], sizes = [8, 16], strides = [1, 1]} : vector<8x64xbf16> to vector<8x16xbf16>
    %53 = vector.extract_strided_slice %48 {offsets = [0, 0], sizes = [16, 16], strides = [1, 1]} : vector<16x64xbf16> to vector<16x16xbf16>
    %cst_31 = arith.constant dense<0.000000e+00> : vector<8x16xf32>
    %54 = tpu.matmul %52, %53, %cst_31 {dimension_numbers = #tpu.dot_dimension_numbers<[1], [1], [0], [0], [0, 0, 1, 0], [], []>} : vector<8x16xbf16>, vector<16x16xbf16>, vector<8x16xf32> -> vector<8x16xf32>
    %cst_32 = arith.constant 2.500000e-01 : f32
    %55 = vector.broadcast %cst_32 : f32 to vector<8x16xf32>
    %56 = arith.mulf %54, %55 : vector<8x16xf32>
    %57 = arith.addf %56, %46 : vector<8x16xf32>
    %cst_33 = arith.constant dense<0xFF800000> : vector<8xf32>
    %58 = vector.multi_reduction <maximumf>, %57, %cst_33 [1] : vector<8x16xf32> to vector<8xf32>
    %59 = vector.shape_cast %58 : vector<8xf32> to vector<8x1xf32>
    %60 = vector.broadcast %59 : vector<8x1xf32> to vector<8x16xf32>
    %61 = arith.subf %57, %60 : vector<8x16xf32>
    %62 = math.exp %61 : vector<8x16xf32>
    %cst_34 = arith.constant dense<0.000000e+00> : vector<8xf32>
    %63 = vector.multi_reduction <add>, %62, %cst_34 [1] : vector<8x16xf32> to vector<8xf32>
    %64 = vector.shape_cast %63 : vector<8xf32> to vector<8x1xf32>
    %65 = tpu.reciprocal %64 {approx = true} : vector<8x1xf32> -> vector<8x1xf32>
    %66 = vector.broadcast %65 : vector<8x1xf32> to vector<8x16xf32>
    %67 = arith.mulf %62, %66 : vector<8x16xf32>
    %68 = arith.truncf %67 : vector<8x16xf32> to vector<8x16xbf16>
    %69 = vector.extract_strided_slice %49 {offsets = [0, 0], sizes = [16, 16], strides = [1, 1]} : vector<16x64xbf16> to vector<16x16xbf16>
    %cst_35 = arith.constant dense<0.000000e+00> : vector<8x16xf32>
    %70 = tpu.matmul %68, %69, %cst_35 {dimension_numbers = #tpu.dot_dimension_numbers<[1], [0], [0], [1], [0, 0, 1, 1], [], []>} : vector<8x16xbf16>, vector<16x16xbf16>, vector<8x16xf32> -> vector<8x16xf32>
    %71 = arith.truncf %70 : vector<8x16xf32> to vector<8x16xbf16>
    %72 = vector.extract_strided_slice %50 {offsets = [0, 0], sizes = [16, 64], strides = [1, 1]} : vector<64x64xbf16> to vector<16x64xbf16>
    %cst_36 = arith.constant dense<0.000000e+00> : vector<8x64xf32>
    %73 = tpu.matmul %71, %72, %cst_36 {dimension_numbers = #tpu.dot_dimension_numbers<[1], [0], [0], [1], [0, 0, 1, 1], [], []>} : vector<8x16xbf16>, vector<16x64xbf16>, vector<8x64xf32> -> vector<8x64xf32>
    %74 = arith.addf %51, %73 : vector<8x64xf32>
    %75 = vector.extract_strided_slice %47 {offsets = [0, 16], sizes = [8, 16], strides = [1, 1]} : vector<8x64xbf16> to vector<8x16xbf16>
    %76 = vector.extract_strided_slice %48 {offsets = [0, 16], sizes = [16, 16], strides = [1, 1]} : vector<16x64xbf16> to vector<16x16xbf16>
    %cst_37 = arith.constant dense<0.000000e+00> : vector<8x16xf32>
    %77 = tpu.matmul %75, %76, %cst_37 {dimension_numbers = #tpu.dot_dimension_numbers<[1], [1], [0], [0], [0, 0, 1, 0], [], []>} : vector<8x16xbf16>, vector<16x16xbf16>, vector<8x16xf32> -> vector<8x16xf32>
    %cst_38 = arith.constant 2.500000e-01 : f32
    %78 = vector.broadcast %cst_38 : f32 to vector<8x16xf32>
    %79 = arith.mulf %77, %78 : vector<8x16xf32>
    %80 = arith.addf %79, %46 : vector<8x16xf32>
    %cst_39 = arith.constant dense<0xFF800000> : vector<8xf32>
    %81 = vector.multi_reduction <maximumf>, %80, %cst_39 [1] : vector<8x16xf32> to vector<8xf32>
    %82 = vector.shape_cast %81 : vector<8xf32> to vector<8x1xf32>
    %83 = vector.broadcast %82 : vector<8x1xf32> to vector<8x16xf32>
    %84 = arith.subf %80, %83 : vector<8x16xf32>
    %85 = math.exp %84 : vector<8x16xf32>
    %cst_40 = arith.constant dense<0.000000e+00> : vector<8xf32>
    %86 = vector.multi_reduction <add>, %85, %cst_40 [1] : vector<8x16xf32> to vector<8xf32>
    %87 = vector.shape_cast %86 : vector<8xf32> to vector<8x1xf32>
    %88 = tpu.reciprocal %87 {approx = true} : vector<8x1xf32> -> vector<8x1xf32>
    %89 = vector.broadcast %88 : vector<8x1xf32> to vector<8x16xf32>
    %90 = arith.mulf %85, %89 : vector<8x16xf32>
    %91 = arith.truncf %90 : vector<8x16xf32> to vector<8x16xbf16>
    %92 = vector.extract_strided_slice %49 {offsets = [0, 16], sizes = [16, 16], strides = [1, 1]} : vector<16x64xbf16> to vector<16x16xbf16>
    %cst_41 = arith.constant dense<0.000000e+00> : vector<8x16xf32>
    %93 = tpu.matmul %91, %92, %cst_41 {dimension_numbers = #tpu.dot_dimension_numbers<[1], [0], [0], [1], [0, 0, 1, 1], [], []>} : vector<8x16xbf16>, vector<16x16xbf16>, vector<8x16xf32> -> vector<8x16xf32>
    %94 = arith.truncf %93 : vector<8x16xf32> to vector<8x16xbf16>
    %95 = vector.extract_strided_slice %50 {offsets = [16, 0], sizes = [16, 64], strides = [1, 1]} : vector<64x64xbf16> to vector<16x64xbf16>
    %cst_42 = arith.constant dense<0.000000e+00> : vector<8x64xf32>
    %96 = tpu.matmul %94, %95, %cst_42 {dimension_numbers = #tpu.dot_dimension_numbers<[1], [0], [0], [1], [0, 0, 1, 1], [], []>} : vector<8x16xbf16>, vector<16x64xbf16>, vector<8x64xf32> -> vector<8x64xf32>
    %97 = arith.addf %74, %96 : vector<8x64xf32>
    %98 = vector.extract_strided_slice %47 {offsets = [0, 32], sizes = [8, 16], strides = [1, 1]} : vector<8x64xbf16> to vector<8x16xbf16>
    %99 = vector.extract_strided_slice %48 {offsets = [0, 32], sizes = [16, 16], strides = [1, 1]} : vector<16x64xbf16> to vector<16x16xbf16>
    %cst_43 = arith.constant dense<0.000000e+00> : vector<8x16xf32>
    %100 = tpu.matmul %98, %99, %cst_43 {dimension_numbers = #tpu.dot_dimension_numbers<[1], [1], [0], [0], [0, 0, 1, 0], [], []>} : vector<8x16xbf16>, vector<16x16xbf16>, vector<8x16xf32> -> vector<8x16xf32>
    %cst_44 = arith.constant 2.500000e-01 : f32
    %101 = vector.broadcast %cst_44 : f32 to vector<8x16xf32>
    %102 = arith.mulf %100, %101 : vector<8x16xf32>
    %103 = arith.addf %102, %46 : vector<8x16xf32>
    %cst_45 = arith.constant dense<0xFF800000> : vector<8xf32>
    %104 = vector.multi_reduction <maximumf>, %103, %cst_45 [1] : vector<8x16xf32> to vector<8xf32>
    %105 = vector.shape_cast %104 : vector<8xf32> to vector<8x1xf32>
    %106 = vector.broadcast %105 : vector<8x1xf32> to vector<8x16xf32>
    %107 = arith.subf %103, %106 : vector<8x16xf32>
    %108 = math.exp %107 : vector<8x16xf32>
    %cst_46 = arith.constant dense<0.000000e+00> : vector<8xf32>
    %109 = vector.multi_reduction <add>, %108, %cst_46 [1] : vector<8x16xf32> to vector<8xf32>
    %110 = vector.shape_cast %109 : vector<8xf32> to vector<8x1xf32>
    %111 = tpu.reciprocal %110 {approx = true} : vector<8x1xf32> -> vector<8x1xf32>
    %112 = vector.broadcast %111 : vector<8x1xf32> to vector<8x16xf32>
    %113 = arith.mulf %108, %112 : vector<8x16xf32>
    %114 = arith.truncf %113 : vector<8x16xf32> to vector<8x16xbf16>
    %115 = vector.extract_strided_slice %49 {offsets = [0, 32], sizes = [16, 16], strides = [1, 1]} : vector<16x64xbf16> to vector<16x16xbf16>
    %cst_47 = arith.constant dense<0.000000e+00> : vector<8x16xf32>
    %116 = tpu.matmul %114, %115, %cst_47 {dimension_numbers = #tpu.dot_dimension_numbers<[1], [0], [0], [1], [0, 0, 1, 1], [], []>} : vector<8x16xbf16>, vector<16x16xbf16>, vector<8x16xf32> -> vector<8x16xf32>
    %117 = arith.truncf %116 : vector<8x16xf32> to vector<8x16xbf16>
    %118 = vector.extract_strided_slice %50 {offsets = [32, 0], sizes = [16, 64], strides = [1, 1]} : vector<64x64xbf16> to vector<16x64xbf16>
    %cst_48 = arith.constant dense<0.000000e+00> : vector<8x64xf32>
    %119 = tpu.matmul %117, %118, %cst_48 {dimension_numbers = #tpu.dot_dimension_numbers<[1], [0], [0], [1], [0, 0, 1, 1], [], []>} : vector<8x16xbf16>, vector<16x64xbf16>, vector<8x64xf32> -> vector<8x64xf32>
    %120 = arith.addf %97, %119 : vector<8x64xf32>
    %121 = vector.extract_strided_slice %47 {offsets = [0, 48], sizes = [8, 16], strides = [1, 1]} : vector<8x64xbf16> to vector<8x16xbf16>
    %122 = vector.extract_strided_slice %48 {offsets = [0, 48], sizes = [16, 16], strides = [1, 1]} : vector<16x64xbf16> to vector<16x16xbf16>
    %cst_49 = arith.constant dense<0.000000e+00> : vector<8x16xf32>
    %123 = tpu.matmul %121, %122, %cst_49 {dimension_numbers = #tpu.dot_dimension_numbers<[1], [1], [0], [0], [0, 0, 1, 0], [], []>} : vector<8x16xbf16>, vector<16x16xbf16>, vector<8x16xf32> -> vector<8x16xf32>
    %cst_50 = arith.constant 2.500000e-01 : f32
    %124 = vector.broadcast %cst_50 : f32 to vector<8x16xf32>
    %125 = arith.mulf %123, %124 : vector<8x16xf32>
    %126 = arith.addf %125, %46 : vector<8x16xf32>
    %cst_51 = arith.constant dense<0xFF800000> : vector<8xf32>
    %127 = vector.multi_reduction <maximumf>, %126, %cst_51 [1] : vector<8x16xf32> to vector<8xf32>
    %128 = vector.shape_cast %127 : vector<8xf32> to vector<8x1xf32>
    %129 = vector.broadcast %128 : vector<8x1xf32> to vector<8x16xf32>
    %130 = arith.subf %126, %129 : vector<8x16xf32>
    %131 = math.exp %130 : vector<8x16xf32>
    %cst_52 = arith.constant dense<0.000000e+00> : vector<8xf32>
    %132 = vector.multi_reduction <add>, %131, %cst_52 [1] : vector<8x16xf32> to vector<8xf32>
    %133 = vector.shape_cast %132 : vector<8xf32> to vector<8x1xf32>
    %134 = tpu.reciprocal %133 {approx = true} : vector<8x1xf32> -> vector<8x1xf32>
    %135 = vector.broadcast %134 : vector<8x1xf32> to vector<8x16xf32>
    %136 = arith.mulf %131, %135 : vector<8x16xf32>
    %137 = arith.truncf %136 : vector<8x16xf32> to vector<8x16xbf16>
    %138 = vector.extract_strided_slice %49 {offsets = [0, 48], sizes = [16, 16], strides = [1, 1]} : vector<16x64xbf16> to vector<16x16xbf16>
    %cst_53 = arith.constant dense<0.000000e+00> : vector<8x16xf32>
    %139 = tpu.matmul %137, %138, %cst_53 {dimension_numbers = #tpu.dot_dimension_numbers<[1], [0], [0], [1], [0, 0, 1, 1], [], []>} : vector<8x16xbf16>, vector<16x16xbf16>, vector<8x16xf32> -> vector<8x16xf32>
    %140 = arith.truncf %139 : vector<8x16xf32> to vector<8x16xbf16>
    %141 = vector.extract_strided_slice %50 {offsets = [48, 0], sizes = [16, 64], strides = [1, 1]} : vector<64x64xbf16> to vector<16x64xbf16>
    %cst_54 = arith.constant dense<0.000000e+00> : vector<8x64xf32>
    %142 = tpu.matmul %140, %141, %cst_54 {dimension_numbers = #tpu.dot_dimension_numbers<[1], [0], [0], [1], [0, 0, 1, 1], [], []>} : vector<8x16xbf16>, vector<16x64xbf16>, vector<8x64xf32> -> vector<8x64xf32>
    %143 = arith.addf %120, %142 : vector<8x64xf32>
    %c0_55 = arith.constant 0 : index
    %c0_56 = arith.constant 0 : index
    %144 = vector.load %arg8[%c0_55, %c0_56] : memref<1x64xf32, #tpu.memory_space<vmem>>, vector<1x64xf32>
    %145 = vector.broadcast %144 : vector<1x64xf32> to vector<8x64xf32>
    %146 = arith.addf %143, %145 : vector<8x64xf32>
    %cst_57 = arith.constant dense<0.000000e+00> : vector<8xf32>
    %147 = vector.multi_reduction <add>, %146, %cst_57 [1] : vector<8x64xf32> to vector<8xf32>
    %148 = vector.shape_cast %147 : vector<8xf32> to vector<8x1xf32>
    %cst_58 = arith.constant 6.400000e+01 : f32
    %149 = vector.broadcast %cst_58 : f32 to vector<8x1xf32>
    %150 = arith.divf %148, %149 : vector<8x1xf32>
    %151 = vector.broadcast %150 : vector<8x1xf32> to vector<8x64xf32>
    %152 = arith.subf %146, %151 : vector<8x64xf32>
    %153 = arith.mulf %152, %152 : vector<8x64xf32>
    %cst_59 = arith.constant dense<0.000000e+00> : vector<8xf32>
    %154 = vector.multi_reduction <add>, %153, %cst_59 [1] : vector<8x64xf32> to vector<8xf32>
    %155 = vector.shape_cast %154 : vector<8xf32> to vector<8x1xf32>
    %cst_60 = arith.constant 6.400000e+01 : f32
    %156 = vector.broadcast %cst_60 : f32 to vector<8x1xf32>
    %157 = arith.divf %155, %156 : vector<8x1xf32>
    %158 = vector.broadcast %150 : vector<8x1xf32> to vector<8x64xf32>
    %159 = arith.subf %146, %158 : vector<8x64xf32>
    %cst_61 = arith.constant 9.99999974E-6 : f32
    %160 = vector.broadcast %cst_61 : f32 to vector<8x1xf32>
    %161 = arith.addf %157, %160 : vector<8x1xf32>
    %162 = math.rsqrt %161 : vector<8x1xf32>
    %163 = vector.broadcast %162 : vector<8x1xf32> to vector<8x64xf32>
    %164 = arith.mulf %159, %163 : vector<8x64xf32>
    %165 = vector.broadcast %4 : vector<1x64xf32> to vector<8x64xf32>
    %166 = arith.mulf %164, %165 : vector<8x64xf32>
    %167 = vector.broadcast %5 : vector<1x64xf32> to vector<8x64xf32>
    %168 = arith.addf %166, %167 : vector<8x64xf32>
    %169 = arith.addf %168, %29 : vector<8x64xf32>
    %cst_62 = arith.constant dense<0.000000e+00> : vector<8xf32>
    %170 = vector.multi_reduction <add>, %169, %cst_62 [1] : vector<8x64xf32> to vector<8xf32>
    %171 = vector.shape_cast %170 : vector<8xf32> to vector<8x1xf32>
    %cst_63 = arith.constant 6.400000e+01 : f32
    %172 = vector.broadcast %cst_63 : f32 to vector<8x1xf32>
    %173 = arith.divf %171, %172 : vector<8x1xf32>
    %174 = vector.broadcast %173 : vector<8x1xf32> to vector<8x64xf32>
    %175 = arith.subf %169, %174 : vector<8x64xf32>
    %176 = arith.mulf %175, %175 : vector<8x64xf32>
    %cst_64 = arith.constant dense<0.000000e+00> : vector<8xf32>
    %177 = vector.multi_reduction <add>, %176, %cst_64 [1] : vector<8x64xf32> to vector<8xf32>
    %178 = vector.shape_cast %177 : vector<8xf32> to vector<8x1xf32>
    %cst_65 = arith.constant 6.400000e+01 : f32
    %179 = vector.broadcast %cst_65 : f32 to vector<8x1xf32>
    %180 = arith.divf %178, %179 : vector<8x1xf32>
    %181 = vector.broadcast %173 : vector<8x1xf32> to vector<8x64xf32>
    %182 = arith.subf %169, %181 : vector<8x64xf32>
    %cst_66 = arith.constant 9.99999974E-6 : f32
    %183 = vector.broadcast %cst_66 : f32 to vector<8x1xf32>
    %184 = arith.addf %180, %183 : vector<8x1xf32>
    %185 = math.rsqrt %184 : vector<8x1xf32>
    %186 = vector.broadcast %185 : vector<8x1xf32> to vector<8x64xf32>
    %187 = arith.mulf %182, %186 : vector<8x64xf32>
    %188 = vector.broadcast %6 : vector<1x64xf32> to vector<8x64xf32>
    %189 = arith.mulf %187, %188 : vector<8x64xf32>
    %190 = vector.broadcast %7 : vector<1x64xf32> to vector<8x64xf32>
    %191 = arith.addf %189, %190 : vector<8x64xf32>
    %192 = arith.truncf %169 : vector<8x64xf32> to vector<8x64xbf16>
    %c0_67 = arith.constant 0 : index
    %c0_68 = arith.constant 0 : index
    %193 = vector.load %arg11[%c0_67, %c0_68] : memref<64x64xbf16, #tpu.memory_space<vmem>>, vector<64x64xbf16>
    %cst_69 = arith.constant dense<0.000000e+00> : vector<8x64xf32>
    %194 = tpu.matmul %192, %193, %cst_69 {dimension_numbers = #tpu.dot_dimension_numbers<[1], [0], [0], [1], [0, 0, 1, 1], [], []>} : vector<8x64xbf16>, vector<64x64xbf16>, vector<8x64xf32> -> vector<8x64xf32>
    %cst_70 = arith.constant 5.000000e-01 : f32
    %195 = vector.broadcast %cst_70 : f32 to vector<8x64xf32>
    %196 = arith.mulf %195, %194 : vector<8x64xf32>
    %cst_71 = arith.constant 4.471500e-02 : f32
    %197 = vector.broadcast %cst_71 : f32 to vector<8x64xf32>
    %198 = arith.mulf %197, %194 : vector<8x64xf32>
    %199 = arith.mulf %198, %194 : vector<8x64xf32>
    %200 = arith.mulf %199, %194 : vector<8x64xf32>
    %201 = arith.addf %194, %200 : vector<8x64xf32>
    %cst_72 = arith.constant 0.797884583 : f32
    %202 = vector.broadcast %cst_72 : f32 to vector<8x64xf32>
    %203 = arith.mulf %202, %201 : vector<8x64xf32>
    %204 = math.tanh %203 : vector<8x64xf32>
    %cst_73 = arith.constant 1.000000e+00 : f32
    %205 = vector.broadcast %cst_73 : f32 to vector<8x64xf32>
    %206 = arith.addf %205, %204 : vector<8x64xf32>
    %207 = arith.mulf %196, %206 : vector<8x64xf32>
    %c0_74 = arith.constant 0 : index
    %c0_75 = arith.constant 0 : index
    %208 = vector.load %arg12[%c0_74, %c0_75] : memref<64x64xbf16, #tpu.memory_space<vmem>>, vector<64x64xbf16>
    %cst_76 = arith.constant dense<0.000000e+00> : vector<8x64xf32>
    %209 = tpu.matmul %192, %208, %cst_76 {dimension_numbers = #tpu.dot_dimension_numbers<[1], [0], [0], [1], [0, 0, 1, 1], [], []>} : vector<8x64xbf16>, vector<64x64xbf16>, vector<8x64xf32> -> vector<8x64xf32>
    %210 = arith.mulf %207, %209 : vector<8x64xf32>
    %211 = arith.truncf %210 : vector<8x64xf32> to vector<8x64xbf16>
    %c0_77 = arith.constant 0 : index
    %c0_78 = arith.constant 0 : index
    %212 = vector.load %arg13[%c0_77, %c0_78] : memref<64x64xbf16, #tpu.memory_space<vmem>>, vector<64x64xbf16>
    %cst_79 = arith.constant dense<0.000000e+00> : vector<8x64xf32>
    %213 = tpu.matmul %211, %212, %cst_79 {dimension_numbers = #tpu.dot_dimension_numbers<[1], [0], [0], [1], [0, 0, 1, 1], [], []>} : vector<8x64xbf16>, vector<64x64xbf16>, vector<8x64xf32> -> vector<8x64xf32>
    %cst_80 = arith.constant dense<0.000000e+00> : vector<8xf32>
    %214 = vector.multi_reduction <add>, %213, %cst_80 [1] : vector<8x64xf32> to vector<8xf32>
    %215 = vector.shape_cast %214 : vector<8xf32> to vector<8x1xf32>
    %cst_81 = arith.constant 6.400000e+01 : f32
    %216 = vector.broadcast %cst_81 : f32 to vector<8x1xf32>
    %217 = arith.divf %215, %216 : vector<8x1xf32>
    %218 = vector.broadcast %217 : vector<8x1xf32> to vector<8x64xf32>
    %219 = arith.subf %213, %218 : vector<8x64xf32>
    %220 = arith.mulf %219, %219 : vector<8x64xf32>
    %cst_82 = arith.constant dense<0.000000e+00> : vector<8xf32>
    %221 = vector.multi_reduction <add>, %220, %cst_82 [1] : vector<8x64xf32> to vector<8xf32>
    %222 = vector.shape_cast %221 : vector<8xf32> to vector<8x1xf32>
    %cst_83 = arith.constant 6.400000e+01 : f32
    %223 = vector.broadcast %cst_83 : f32 to vector<8x1xf32>
    %224 = arith.divf %222, %223 : vector<8x1xf32>
    %225 = vector.broadcast %217 : vector<8x1xf32> to vector<8x64xf32>
    %226 = arith.subf %213, %225 : vector<8x64xf32>
    %cst_84 = arith.constant 9.99999974E-6 : f32
    %227 = vector.broadcast %cst_84 : f32 to vector<8x1xf32>
    %228 = arith.addf %224, %227 : vector<8x1xf32>
    %229 = math.rsqrt %228 : vector<8x1xf32>
    %230 = vector.broadcast %229 : vector<8x1xf32> to vector<8x64xf32>
    %231 = arith.mulf %226, %230 : vector<8x64xf32>
    %232 = vector.broadcast %6 : vector<1x64xf32> to vector<8x64xf32>
    %233 = arith.mulf %231, %232 : vector<8x64xf32>
    %234 = vector.broadcast %7 : vector<1x64xf32> to vector<8x64xf32>
    %235 = arith.addf %233, %234 : vector<8x64xf32>
    %236 = arith.addf %235, %191 : vector<8x64xf32>
    %c0_85 = arith.constant 0 : index
    %c0_86 = arith.constant 0 : index
    %c0_87 = arith.constant 0 : index
    %237 = vector.load %arg16[%c0_85, %c0_86, %c0_87] : memref<1x8x64xf32, #tpu.memory_space<vmem>>, vector<1x8x64xf32>
    %238 = vector.shape_cast %237 : vector<1x8x64xf32> to vector<8x64xf32>
    %239 = vector.shape_cast %236 : vector<8x64xf32> to vector<1x8x64xf32>
    tpu.vector_store %arg16[%c0_85, %c0_86, %c0_87], %239 {strides = array<i32>} : memref<1x8x64xf32, #tpu.memory_space<vmem>>, vector<1x8x64xf32>,
    return
  }
  func.func @transform_0(%arg0: i32, %arg1: i32) -> (i32, i32, i32) {
    %c0_i32 = arith.constant 0 : i32
    %c0_i32_0 = arith.constant 0 : i32
    return %arg0, %arg1, %c0_i32 : i32, i32, i32
  }
  func.func @transform_1(%arg0: i32, %arg1: i32) -> (i32, i32, i32) {
    %c0_i32 = arith.constant 0 : i32
    %c0_i32_0 = arith.constant 0 : i32
    %c0_i32_1 = arith.constant 0 : i32
    return %arg0, %c0_i32, %c0_i32_0 : i32, i32, i32
  }
  func.func @transform_2(%arg0: i32, %arg1: i32) -> (i32, i32) {
    %c0_i32 = arith.constant 0 : i32
    %c0_i32_0 = arith.constant 0 : i32
    %c0_i32_1 = arith.constant 0 : i32
    return %c0_i32, %c0_i32_0 : i32, i32
  }
  func.func @transform_3(%arg0: i32, %arg1: i32) -> (i32, i32) {
    %c0_i32 = arith.constant 0 : i32
    %c0_i32_0 = arith.constant 0 : i32
    %c0_i32_1 = arith.constant 0 : i32
    return %c0_i32, %c0_i32_0 : i32, i32
  }
  func.func @transform_4(%arg0: i32, %arg1: i32) -> (i32, i32) {
    %c0_i32 = arith.constant 0 : i32
    %c0_i32_0 = arith.constant 0 : i32
    %c0_i32_1 = arith.constant 0 : i32
    return %c0_i32, %c0_i32_0 : i32, i32
  }
  func.func @transform_5(%arg0: i32, %arg1: i32) -> (i32, i32) {
    %c0_i32 = arith.constant 0 : i32
    %c0_i32_0 = arith.constant 0 : i32
    %c0_i32_1 = arith.constant 0 : i32
    return %c0_i32, %c0_i32_0 : i32, i32
  }
  func.func @transform_6(%arg0: i32, %arg1: i32) -> (i32, i32) {
    %c0_i32 = arith.constant 0 : i32
    %c0_i32_0 = arith.constant 0 : i32
    %c0_i32_1 = arith.constant 0 : i32
    return %c0_i32, %c0_i32_0 : i32, i32
  }
  func.func @transform_7(%arg0: i32, %arg1: i32) -> (i32, i32) {
    %c0_i32 = arith.constant 0 : i32
    %c0_i32_0 = arith.constant 0 : i32
    %c0_i32_1 = arith.constant 0 : i32
    return %c0_i32, %c0_i32_0 : i32, i32
  }
  func.func @transform_8(%arg0: i32, %arg1: i32) -> (i32, i32) {
    %c0_i32 = arith.constant 0 : i32
    %c0_i32_0 = arith.constant 0 : i32
    %c0_i32_1 = arith.constant 0 : i32
    return %c0_i32, %c0_i32_0 : i32, i32
  }
  func.func @transform_9(%arg0: i32, %arg1: i32) -> (i32, i32) {
    %c0_i32 = arith.constant 0 : i32
    %c0_i32_0 = arith.constant 0 : i32
    %c0_i32_1 = arith.constant 0 : i32
    return %c0_i32, %c0_i32_0 : i32, i32
  }
  func.func @transform_10(%arg0: i32, %arg1: i32) -> (i32, i32) {
    %c0_i32 = arith.constant 0 : i32
    %c0_i32_0 = arith.constant 0 : i32
    %c0_i32_1 = arith.constant 0 : i32
    return %c0_i32, %c0_i32_0 : i32, i32
  }
  func.func @transform_11(%arg0: i32, %arg1: i32) -> (i32, i32) {
    %c0_i32 = arith.constant 0 : i32
    %c0_i32_0 = arith.constant 0 : i32
    %c0_i32_1 = arith.constant 0 : i32
    return %c0_i32, %c0_i32_0 : i32, i32
  }
  func.func @transform_12(%arg0: i32, %arg1: i32) -> (i32, i32) {
    %c0_i32 = arith.constant 0 : i32
    %c0_i32_0 = arith.constant 0 : i32
    %c0_i32_1 = arith.constant 0 : i32
    return %c0_i32, %c0_i32_0 : i32, i32
  }
  func.func @transform_13(%arg0: i32, %arg1: i32) -> (i32, i32) {
    %c0_i32 = arith.constant 0 : i32
    %c0_i32_0 = arith.constant 0 : i32
    %c0_i32_1 = arith.constant 0 : i32
    return %c0_i32, %c0_i32_0 : i32, i32
  }
  func.func @transform_14(%arg0: i32, %arg1: i32) -> (i32, i32, i32) {
    %c0_i32 = arith.constant 0 : i32
    %c0_i32_0 = arith.constant 0 : i32
    return %arg0, %arg1, %c0_i32 : i32, i32, i32
  }
}

</mosaic_0001>

<bundles_post_ra>
// kernel: tpu_custom_call.1
= control target key start
LH: loop header
LB: loop body
LE: loop exit
PB: predicated region body
PF: predicated region fallthrough
CT: control target
= control target key end

     0   :  { %s3767_s0 = inlined_call_operand.hbm [shape: f32[2,16,64], index: 0, kind: input, shape index: {}]   ;;  %s3768_s1 = inlined_call_operand.hbm [shape: f32[2,16,64], index: 1, kind: input, shape index: {}]   ;;  %s3769_s2 = inlined_call_operand.hbm [shape: bf16[64,64], index: 2, kind: input, shape index: {}]   ;;  %s3770_s3 = inlined_call_operand.hbm [shape: bf16[64,64], index: 3, kind: input, shape index: {}]   ;;  %s3771_s4 = inlined_call_operand.hbm [shape: bf16[64,64], index: 4, kind: input, shape index: {}]   ;;  %s3772_s5 = inlined_call_operand.hbm [shape: bf16[64,64], index: 5, kind: input, shape index: {}]   ;;  %s3773_s6 = inlined_call_operand.vmem [shape: f32[1,64], index: 6, kind: input, shape index: {}]   ;;  %s3774_s7 = inlined_call_operand.vmem [shape: f32[1,64], index: 7, kind: input, shape index: {}]   ;;  %s3775_s8 = inlined_call_operand.hbm [shape: f32[1,64], index: 8, kind: input, shape index: {}]   ;;  %s3776_s9 = inlined_call_operand.vmem [shape: bf16[64,64], index: 9, kind: input, shape index: {}]   ;;  %s3777_s10 = inlined_call_operand.hbm [shape: bf16[64,64], index: 10, kind: input, shape index: {}]   ;;  %s3778_s11 = inlined_call_operand.hbm [shape: bf16[64,64], index: 11, kind: input, shape index: {}]   ;;  %s3779_s12 = inlined_call_operand.vmem [shape: f32[1,64], index: 12, kind: input, shape index: {}]   ;;  %s3780_s13 = inlined_call_operand.vmem [shape: f32[1,64], index: 13, kind: input, shape index: {}]   ;;  %s3781_s14 = inlined_call_operand.hbm [shape: f32[2,16,64], index: 14, kind: output, shape index: {}]  }
   0x1   :  { %3798 = sst [smem:[#allocation30_spill]] %s3767_s0 }
   0x2   :  { %3799 = sst [smem:[#allocation31_spill]] %s3768_s1 }
   0x3   :  { %3800 = sst [smem:[#allocation32_spill]] %s3769_s2 }
   0x4   :  { %3801 = sst [smem:[#allocation33_spill]] %s3770_s3 }
   0x5   :  { %3802 = sst [smem:[#allocation34_spill]] %s3771_s4 }
   0x6   :  { %3803 = sst [smem:[#allocation35_spill]] %s3772_s5 }
   0x7   :  { %3804 = sst [smem:[#allocation36_spill]] %s3773_s6 }
   0x8   :  { %3805 = sst [smem:[#allocation37_spill]] %s3774_s7 }
   0x9   :  { %3806 = sst [smem:[#allocation38_spill]] %s3775_s8 }
   0xa   :  { %3807 = sst [smem:[#allocation39_spill]] %s3776_s9 }
   0xb   :  { %3808 = sst [smem:[#allocation40_spill]] %s3777_s10 }
   0xc   :  { %3809 = sst [smem:[#allocation41_spill]] %s3778_s11 }
   0xd   :  { %3810 = sst [smem:[#allocation42_spill]] %s3779_s12 }
   0xe   :  { %3811 = sst [smem:[#allocation43_spill]] %s3780_s13 }
   0xf   :  { %3812 = sst [smem:[#allocation44_spill]] %s3781_s14 }
  0x10   :  { %19 = vsyncpa [#allocation3], 0 }
  0x11   :  { %21 = vsyncpa [#allocation3 + $0x1], 0 }
  0x12   :  { %22 = vsyncpa [#allocation6], 0 }
  0x13   :  { %24 = vsyncpa [#allocation6 + $0x1], 0 }
  0x14   :  { %25 = vsyncpa [#allocation9], 0 }
  0x15   :  { %26 = vsyncpa [#allocation12], 0 }
  0x16   :  { %27 = vsyncpa [#allocation15], 0 }
  0x17   :  { %28 = vsyncpa [#allocation4], 0 }
  0x18   :  { %30 = vsyncpa [#allocation4 + $0x1], 0  ;;  %s3075_s29 = smov 0   ;;  %s3077_s30 = smov 0  }
  0x19   :  { %s3079_s15 = smov 0   ;;  %s3081_s16 = smov 0  }
  0x1a   :  { %s3083_s17 = smov 0   ;;  %s3085_s18 = smov 0  }
  0x1b   :  { %s3087_s19 = smov 0   ;;  %s3089_s20 = smov 0  }
  0x1c   :  { %s3091_s21 = smov 0   ;;  %s3093_s22 = smov 0  }
  0x1d   :  { %s3095_s23 = smov 0  }
  0x1e LB: > { %3813 = sst [smem:[#allocation25_spill]] %s2938_s29  ;;  %s3131_s24 = sadd.s32 4294967295, %s2978_s23   ;;  %s2978_s23 = sphi %s3095_s23, %s36_s23   ;;  %s2974_s22 = sphi %s3093_s22, %s3877_s22   ;;  %s2970_s21 = sphi %s3091_s21, %s3876_s21   ;;  %s2966_s20 = sphi %s3089_s20, %s3875_s20   ;;  %s2962_s19 = sphi %s3087_s19, %s3874_s19   ;;  %s2958_s18 = sphi %s3085_s18, %s3873_s18   ;;  %s2954_s17 = sphi %s3083_s17, %s3872_s17   ;;  %s2950_s16 = sphi %s3081_s16, %s3871_s16   ;;  %s2946_s15 = sphi %s3079_s15, %s3870_s15   ;;  %s2942_s30 = sphi %s3077_s30, %s3869_s30   ;;  %s2938_s29 = sphi %s3075_s29, %s3868_s29  }
  0x1f   : > { %3814 = sst [smem:[#allocation26_spill]] %s2962_s19  ;;  %p2056_p0 = scmp.ge.s32.totalorder %s2978_s23, 1 }
  0x20   : > { %3815 = sst [smem:[#allocation27_spill]] %s2966_s20  ;;  %p3791_p1 = scmp.eq.s32.totalorder %s3131_s24, 0 }
  0x21   : > { %3816 = sst [smem:[#allocation28_spill]] %s3131_s24  ;;  %p387_p2 = scmp.lt.s32.totalorder %s2978_s23, 5 }
  0x22   : > { %s2980_s26 = smov [#allocation7]   ;;  %s2981_s14 = smov [#allocation8]  }
  0x23   : > { %p3136_p3 = pnand %p2056_p0, %p387_p2  ;;  %s399_s27 = sshll.u32 %s2980_s26, 4  ;;  %s3140_s27 = int_to_ptr.vmem [resolvable:$true] %s399_s27 }
  0x24   : > { %s412_s13 = sshll.u32 %s2981_s14, 4  ;;  %s2982_s12 = smov [#allocation11]   ;;  %s3150_s13 = int_to_ptr.vmem [resolvable:$true] %s412_s13 }
  0x25   : > { %s3817_s25 = scalar_select %p3136_p3, 1, 0 }
  0x26   : > { %p2372_p4 = pneg %p3136_p3  ;;  %s3152_s20 = sshll.u32 %s2982_s12, 4  ;;  %s439_s20 = int_to_ptr.vmem [resolvable:$true] %s3152_s20 }
  0x27   : > { %3818 = sst [smem:[#allocation29_spill]] %s3817_s25  ;;  %s3820_s2 = sld [smem:[#allocation32_spill]] }
  0x28   : > { %p3146_p5 = pnand %p2372_p4, %p3791_p1 }
  0x2a   : > { %p3162_p7 = pneg %p3146_p5 }
  0x2d   : > { %s2580_s26 = scalar_lea.hbm %s3820_s2, 512 }
  0x2e   : > { %p2581_p6 = scmp.ne.s32.totalorder %s3820_s2, %s2580_s26  ;;  %p2587_p10 = scmp.lt.u32.totalorder %s2580_s26, %s3820_s2 }
  0x30   : > { %p2583_p8 = pnand %p3162_p7, %p2581_p6 }
  0x32   : > { %p2584_p9 = pneg %p2583_p8 }
  0x34   : > { %p2589_p11 = pnand %p2587_p10, %p2584_p9 }
  0x36   : > { %2592 = shalt.err (!%p2589_p11)
}
  0x37   : > { %s2593_s6 = scalar_lea.vmem %s3140_s27, 512  ;;  %p2601_p2 = scmp.lt.s32.totalorder %s3140_s27, %s3140_s27 }
  0x38   : > { %p2594_p12 = scmp.ne.s32.totalorder %s3140_s27, %s2593_s6  ;;  %p2602_p4 = scmp.lt.s32.totalorder %s2593_s6, %s2593_s6 }
  0x3a   : > { %p2596_p13 = pnand %p2594_p12, %p3162_p7  ;;  %p2603_p6 = por %p2602_p4, %p2601_p2 }
  0x3c   : > { %p2597_p0 = pneg %p2596_p13 }
  0x3e   : > { %p2604_p8 = pnand %p2603_p6, %p2597_p0 }
  0x40   : > { %2607 = shalt.err (!%p2604_p8)
}
  0x41   : > { %s2983_s7 = smov 64   ;;  %s2984_s9 = smov 4  }
  0x42   : > { %2375 = dma.hbm_to_vmem [thread:$0]  (!%p3146_p5), %s3820_s2, 512, %s3140_s27, [#allocation6], %s2983_s7, %s2983_s7, %s2984_s9  }
  0x43   : > { %s3822_s3 = sld [smem:[#allocation33_spill]] }
  0x49   : > { %s2608_s6 = scalar_lea.hbm %s3822_s3, 512 }
  0x4a   : > { %p2609_p9 = scmp.ne.s32.totalorder %s3822_s3, %s2608_s6  ;;  %p2615_p12 = scmp.lt.u32.totalorder %s2608_s6, %s3822_s3 }
  0x4c   : > { %p2611_p10 = pnand %p2609_p9, %p3162_p7 }
  0x4e   : > { %p2612_p11 = pneg %p2611_p10 }
  0x50   : > { %p2617_p13 = pnand %p2615_p12, %p2612_p11 }
  0x52   : > { %2620 = shalt.err (!%p2617_p13)
}
  0x53   : > { %s2621_s27 = scalar_lea.vmem %s3150_s13, 512  ;;  %p2629_p6 = scmp.lt.s32.totalorder %s3150_s13, %s3150_s13 }
  0x54   : > { %p2622_p0 = scmp.ne.s32.totalorder %s3150_s13, %s2621_s27  ;;  %p2630_p8 = scmp.lt.s32.totalorder %s2621_s27, %s2621_s27 }
  0x56   : > { %p2624_p2 = pnand %p2622_p0, %p3162_p7  ;;  %p2631_p9 = por %p2630_p8, %p2629_p6 }
  0x58   : > { %p2625_p4 = pneg %p2624_p2 }
  0x5a   : > { %p2632_p10 = pnand %p2631_p9, %p2625_p4 }
  0x5c   : > { %2635 = shalt.err (!%p2632_p10)
}
  0x5d   : > { %2378 = dma.hbm_to_vmem [thread:$0]  (!%p3146_p5), %s3822_s3, 512, %s3150_s13, [#allocation9], %s2983_s7, %s2983_s7, %s2984_s9  }
  0x5e   : > { %s3823_s5 = sld [smem:[#allocation35_spill]] }
  0x64   : > { %s2636_s19 = scalar_lea.hbm %s3823_s5, 512 }
  0x65   : > { %p2637_p11 = scmp.ne.s32.totalorder %s3823_s5, %s2636_s19  ;;  %p2643_p0 = scmp.lt.u32.totalorder %s2636_s19, %s3823_s5 }
  0x67   : > { %p2639_p12 = pnand %p2637_p11, %p3162_p7 }
  0x69   : > { %p2640_p13 = pneg %p2639_p12 }
  0x6b   : > { %p2645_p2 = pnand %p2643_p0, %p2640_p13 }
  0x6d   : > { %2648 = shalt.err (!%p2645_p2)
}
  0x6e   : > { %s2649_s27 = scalar_lea.vmem %s439_s20, 512  ;;  %p2657_p9 = scmp.lt.s32.totalorder %s439_s20, %s439_s20 }
  0x6f   : > { %p2650_p4 = scmp.ne.s32.totalorder %s439_s20, %s2649_s27  ;;  %p2658_p10 = scmp.lt.s32.totalorder %s2649_s27, %s2649_s27 }
  0x71   : > { %p2652_p6 = pnand %p2650_p4, %p3162_p7  ;;  %p2659_p1 = por %p2658_p10, %p2657_p9 }
  0x73   : > { %p2653_p8 = pneg %p2652_p6 }
  0x75   : > { %p2660_p3 = pnand %p2659_p1, %p2653_p8 }
  0x77   : > { %2663 = shalt.err (!%p2660_p3)
}
  0x78   : > { %2384 = dma.hbm_to_vmem [thread:$0]  (!%p3146_p5), %s3823_s5, 512, %s439_s20, [#allocation12], %s2983_s7, %s2983_s7, %s2984_s9  }
  0x79   : > { %s2985_s1 = smov [#allocation14]   ;;  %s2986_s24 = smov [#allocation10]  }
  0x7a   : > { %s471_s29 = sshll.u32 %s2985_s1, 4  ;;  %s425_s19 = sshll.u32 %s2986_s24, 4  ;;  %s472_s29 = int_to_ptr.vmem [resolvable:$true] %s471_s29  ;;  %s426_s19 = int_to_ptr.vmem [resolvable:$true] %s425_s19 }
  0x7b   : > { %s3824_s10 = sld [smem:[#allocation40_spill]] }
  0x81   : > { %s2664_s12 = scalar_lea.hbm %s3824_s10, 512 }
  0x82   : > { %p2665_p1 = scmp.ne.s32.totalorder %s3824_s10, %s2664_s12  ;;  %p2671_p12 = scmp.lt.u32.totalorder %s2664_s12, %s3824_s10 }
  0x84   : > { %p2667_p3 = pnand %p2665_p1, %p3162_p7 }
  0x86   : > { %p2668_p11 = pneg %p2667_p3 }
  0x88   : > { %p2673_p13 = pnand %p2671_p12, %p2668_p11 }
  0x8a   : > { %2676 = shalt.err (!%p2673_p13)
}
  0x8b   : > { %s2677_s20 = scalar_lea.vmem %s472_s29, 512  ;;  %p2685_p6 = scmp.lt.s32.totalorder %s472_s29, %s472_s29 }
  0x8c   : > { %p2678_p0 = scmp.ne.s32.totalorder %s472_s29, %s2677_s20  ;;  %p2686_p8 = scmp.lt.s32.totalorder %s2677_s20, %s2677_s20 }
  0x8e   : > { %p2680_p2 = pnand %p2678_p0, %p3162_p7  ;;  %p2687_p9 = por %p2686_p8, %p2685_p6 }
  0x90   : > { %p2681_p4 = pneg %p2680_p2 }
  0x92   : > { %p2688_p10 = pnand %p2687_p9, %p2681_p4 }
  0x94   : > { %2691 = shalt.err (!%p2688_p10)
}
  0x95   : > { %2390 = dma.hbm_to_vmem [thread:$0]  (!%p3146_p5), %s3824_s10, 512, %s472_s29, [#allocation15], %s2983_s7, %s2983_s7, %s2984_s9  }
  0x96   : > { %s3825_s4 = sld [smem:[#allocation34_spill]] }
  0x9c   : > { %s2692_s26 = scalar_lea.hbm %s3825_s4, 512 }
  0x9d   : > { %p2693_p1 = scmp.ne.s32.totalorder %s3825_s4, %s2692_s26  ;;  %p2699_p12 = scmp.lt.u32.totalorder %s2692_s26, %s3825_s4 }
  0x9f   : > { %p2695_p3 = pnand %p2693_p1, %p3162_p7 }
  0xa1   : > { %p2696_p11 = pneg %p2695_p3 }
  0xa3   : > { %p2701_p13 = pnand %p2699_p12, %p2696_p11 }
  0xa5   : > { %2704 = shalt.err (!%p2701_p13)
}
  0xa6   : > { %s2705_s13 = scalar_lea.vmem %s426_s19, 512  ;;  %p2713_p6 = scmp.lt.s32.totalorder %s426_s19, %s426_s19 }
  0xa7   : > { %p2706_p0 = scmp.ne.s32.totalorder %s426_s19, %s2705_s13  ;;  %p2714_p8 = scmp.lt.s32.totalorder %s2705_s13, %s2705_s13 }
  0xa9   : > { %p2708_p2 = pnand %p2706_p0, %p3162_p7  ;;  %p2715_p9 = por %p2714_p8, %p2713_p6 }
  0xab   : > { %p2709_p4 = pneg %p2708_p2 }
  0xad   : > { %p2716_p10 = pnand %p2715_p9, %p2709_p4 }
  0xaf   : > { %2719 = shalt.err (!%p2716_p10)
}
  0xb0   : > { %2381 = dma.hbm_to_vmem [thread:$0]  (!%p3146_p5), %s3825_s4, 512, %s426_s19, [#allocation9], %s2983_s7, %s2983_s7, %s2984_s9  }
  0xb1   : > { %s2987_s2 = smov [#allocation13]   ;;  %s2988_s1 = smov [#allocation16]  }
  0xb2   : > { %s458_s0 = sshll.u32 %s2987_s2, 4  ;;  %s484_s24 = sshll.u32 %s2988_s1, 4  ;;  %s459_s0 = int_to_ptr.vmem [resolvable:$true] %s458_s0  ;;  %s485_s24 = int_to_ptr.vmem [resolvable:$true] %s484_s24 }
  0xb3   : > { %s3826_s8 = sld [smem:[#allocation38_spill]] }
  0xb9   : > { %s2720_s12 = scalar_lea.hbm %s3826_s8, 16 }
  0xba   : > { %p2721_p1 = scmp.ne.s32.totalorder %s3826_s8, %s2720_s12  ;;  %p2727_p12 = scmp.lt.u32.totalorder %s2720_s12, %s3826_s8 }
  0xbc   : > { %p2723_p3 = pnand %p2721_p1, %p3162_p7 }
  0xbe   : > { %p2724_p11 = pneg %p2723_p3 }
  0xc0   : > { %p2729_p13 = pnand %p2727_p12, %p2724_p11 }
  0xc2   : > { %2732 = shalt.err (!%p2729_p13)
}
  0xc3   : > { %s2733_s19 = scalar_lea.vmem %s459_s0, 16  ;;  %s2740_s20 = scalar_lea.vmem %s459_s0, 32 }
  0xc4   : > { %p2734_p0 = scmp.ne.s32.totalorder %s459_s0, %s2733_s19  ;;  %p2741_p6 = scmp.lt.s32.totalorder %s459_s0, %s459_s0 }
  0xc5   : > { %p2742_p8 = scmp.lt.s32.totalorder %s2740_s20, %s2733_s19 }
  0xc6   : > { %p2736_p2 = pnand %p2734_p0, %p3162_p7 }
  0xc7   : > { %p2743_p9 = por %p2742_p8, %p2741_p6 }
  0xc8   : > { %p2737_p4 = pneg %p2736_p2 }
  0xca   : > { %p2744_p10 = pnand %p2743_p9, %p2737_p4 }
  0xcc   : > { %2747 = shalt.err (!%p2744_p10)
}
  0xcd   : > { %2387 = dma.hbm_to_vmem [thread:$0]  (!%p3146_p5), %s3826_s8, 16, %s459_s0, [#allocation12]  }
  0xce   : > { %s3827_s11 = sld [smem:[#allocation41_spill]] }
  0xd4   : > { %s2748_s12 = scalar_lea.hbm %s3827_s11, 512 }
  0xd5   : > { %p2749_p1 = scmp.ne.s32.totalorder %s3827_s11, %s2748_s12  ;;  %p2755_p12 = scmp.lt.u32.totalorder %s2748_s12, %s3827_s11 }
  0xd7   : > { %p2751_p3 = pnand %p2749_p1, %p3162_p7 }
  0xd9   : > { %p2752_p11 = pneg %p2751_p3 }
  0xdb   : > { %p2757_p13 = pnand %p2755_p12, %p2752_p11 }
  0xdd   : > { %2760 = shalt.err (!%p2757_p13)
}
  0xde   : > { %s2761_s19 = scalar_lea.vmem %s485_s24, 512  ;;  %p2769_p6 = scmp.lt.s32.totalorder %s485_s24, %s485_s24 }
  0xdf   : > { %p2762_p0 = scmp.ne.s32.totalorder %s485_s24, %s2761_s19  ;;  %p2770_p8 = scmp.lt.s32.totalorder %s2761_s19, %s2761_s19 }
  0xe1   : > { %p2764_p2 = pnand %p2762_p0, %p3162_p7  ;;  %p2771_p9 = por %p2770_p8, %p2769_p6 }
  0xe3   : > { %p2765_p4 = pneg %p2764_p2 }
  0xe5   : > { %p2772_p10 = pnand %p2771_p9, %p2765_p4 }
  0xe7   : > { %2775 = shalt.err (!%p2772_p10)
}
  0xe8   : > { %2393 = dma.hbm_to_vmem [thread:$0]  (!%p3146_p5), %s3827_s11, 512, %s485_s24, [#allocation15], %s2983_s7, %s2983_s7, %s2984_s9  }
  0xe9   : > { %s2055_s25 = sadd.s32 4294967294, %s2978_s23   ;;  %s3828_s28 = sld [smem:[#allocation28_spill]] }
  0xea   : > { %s45_s2 = sadd.s32 1, %s2970_s21  ;;  %s48_s1 = sadd.s32 1, %s2974_s22 }
  0xeb   : > { %p46_p7 = scmp.ge.s32.totalorder %s45_s2, 2  ;;  %s3829_s26 = sld [smem:[#allocation25_spill]] }
  0xec   : > { %s57_s14 = sadd.s32 1, %s2958_s18  ;;  %p64_p1 = scmp.ne.s32.totalorder %s2958_s18, %s2954_s17 }
  0xed   : > { %p65_p3 = scmp.eq.s32.totalorder %s2978_s23, 0  ;;  %s3879_s2 = smov (%p46_p7, %s45_s2), 0 }
  0xee   : > { %s3881_s1 = smov (!%p46_p7, %s48_s1), %s2974_s22  ;;  %s53_s7 = ssub.s32 %s2970_s21, %s3879_s2 }
  0xef   : > { %p3330_p5 = por %p65_p3, %p64_p1  ;;  %p50_p11 = scmp.ge.s32.totalorder %s3881_s1, 2 }
  0xf0   : > { %p70_p12 = scmp.ne.s32.totalorder %s2954_s17, %s2950_s16  ;;  %s83_s24 = sadd.s32 1, %s2946_s15 }
  0xf1   : > { %p90_p13 = scmp.ne.s32.totalorder %s2946_s15, %s2942_s30  ;;  %s3883_s1 = smov (%p50_p11, %s3881_s1), 0 }
  0xf2   : > { %p3831_p0 = scmp.eq.s32.totalorder %s3828_s28, 0  ;;  %s52_s27 = ssub.s32 %s2974_s22, %s3883_s1 }
  0xf3   : > { %p3350_p4 = por %p90_p13, %p65_p3  ;;  %p96_p6 = scmp.ne.s32.totalorder %s2942_s30, %s3829_s26 }
  0xf4   : > { %p3346_p2 = por %p3831_p0, %p70_p12  ;;  %s54_s13 = sor.u32 %s53_s7, %s52_s27 }
  0xf5   : > { %p81_p8 = scmp.eq.s32.totalorder %s52_s27, 0  ;;  %p55_p9 = scmp.eq.s32.totalorder %s54_s13, 0 }
  0xf6   : > { %s3832_s12 = scalar_select %p3346_p2, 1, 0 }
  0xf7   : > { %p3834_p10 = pmov %p3831_p0  ;;  %p374_p3 = scmp.eq.s32.totalorder %s3828_s28, 3 }
  0xf8   : > { %s3365_s19 = scalar_select %p81_p8, %s2946_s15, %s83_s24  }
  0xf9   : > { %p3360_p7 = por %p96_p6, %p3834_p10  ;;  %p380_p11 = scmp.eq.s32.totalorder %s2055_s25, 3 }
  0xfa   : > { %s3368_s0 = scalar_select %p55_p9, %s2958_s18, %s57_s14  }
  0xfb   : > { %s3835_s29 = scalar_select %p3360_p7, 1, 0 }
  0xfc   : > { %p2412_p13 = scmp.lt.s32.totalorder %s2978_s23, 4  ;;  %s504_s20 = sand.u32 1, %s2958_s18  }
  0xfd   : > { %p3376_p0 = por %p374_p3, %p64_p1  ;;  %p3383_p6 = por %p380_p11, %p70_p12 }
  0xfe   : > { %s2065_s24 = sshll.u32 %s504_s20, 3  ;;  %s2066_s14 = sshll.u32 %s2974_s22, 1 }
  0xff   : > { %s3836_s26 = scalar_select %p3376_p0, 1, 0 }
 0x100   : > { %s3837_s7 = scalar_select %p3383_p6, 1, 0 }
 0x101   : > { %s513_s27 = sadd.s32 %s2970_s21, %s2066_s14  ;;  %s508_s13 = scalar_lea.vmem [#allocation2], %s2065_s24 }
 0x102   : > { %s517_s3 = sshll.u32 %s508_s13, 4  ;;  %s2067_s28 = sshll.u32 %s513_s27, 7  ;;  %s3389_s3 = int_to_ptr.vmem [resolvable:$true] %s517_s3 }
 0x103   : > { %s3838_s5 = sld [smem:[#allocation30_spill]]  ;;  %p3400_p1 = pnand %p2412_p13, %p3330_p5 }
 0x104   : > { %p3408_p12 = pnand %p2412_p13, %p3350_p4  ;;  %s505_s14 = scalar_lea.sflag [#allocation3], %s504_s20 }
 0x105   : > { %p2778_p9 = pneg %p3400_p1 }
 0x109   : > { %s3394_s8 = scalar_lea.hbm %s3838_s5, %s2067_s28  ;;  %s2781_s6 = scalar_lea.hbm %s3838_s5, 512 }
 0x10a   : > { %s2776_s9 = scalar_lea.hbm %s3394_s8, 128  ;;  %p2782_p4 = scmp.lt.u32.totalorder %s3394_s8, %s3838_s5 }
 0x10b   : > { %p2777_p8 = scmp.ne.s32.totalorder %s3394_s8, %s2776_s9  ;;  %p2783_p3 = scmp.lt.u32.totalorder %s2781_s6, %s2776_s9 }
 0x10c   : > { %p2785_p13 = scmp.lt.u32.totalorder %s2776_s9, %s3394_s8 }
 0x10d   : > { %p2779_p5 = pnand %p2778_p9, %p2777_p8  ;;  %p2784_p11 = por %p2783_p3, %p2782_p4 }
 0x10f   : > { %p2780_p10 = pneg %p2779_p5  ;;  %p2786_p6 = por %p2785_p13, %p2784_p11 }
 0x111   : > { %p2787_p0 = pnand %p2786_p6, %p2780_p10 }
 0x113   : > { %2790 = shalt.err (!%p2787_p0)
}
 0x114   : > { %s2791_s20 = scalar_lea.vmem %s3389_s3, 128  ;;  %s2989_s27 = smov [#allocation2]  }
 0x115   : > { %p2792_p8 = scmp.ne.s32.totalorder %s3389_s3, %s2791_s20  ;;  %s2796_s13 = sshll.u32 %s2989_s27, 4  ;;  %s2797_s13 = int_to_ptr.vmem [resolvable:$false] %s2796_s13 }
 0x116   : > { %s2798_s28 = scalar_lea.vmem %s2797_s13, 256  ;;  %p2799_p2 = scmp.lt.s32.totalorder %s3389_s3, %s2797_s13 }
 0x117   : > { %p2794_p5 = pnand %p2792_p8, %p2778_p9  ;;  %p2800_p4 = scmp.lt.s32.totalorder %s2798_s28, %s2791_s20 }
 0x119   : > { %p2795_p7 = pneg %p2794_p5  ;;  %p2801_p3 = por %p2800_p4, %p2799_p2 }
 0x11b   : > { %p2802_p11 = pnand %p2801_p3, %p2795_p7 }
 0x11d   : > { %2805 = shalt.err (!%p2802_p11)
}
 0x11e   : > { %2397 = dma.hbm_to_vmem [thread:$0]  (!%p3400_p1), %s3394_s8, 128, %s3389_s3, %s505_s14  }
 0x11f   : > { %s526_s9 = sand.u32 1, %s2946_s15   ;;  %s2139_s25 = sshll.u32 %s2974_s22, 8 }
 0x120   : > { %s2068_s6 = sshll.u32 %s526_s9, 4  ;;  %s3841_s13 = sld [smem:[#allocation31_spill]] }
 0x121   : > { %s528_s10 = scalar_lea.vmem [#allocation5], %s2068_s6  ;;  %s3842_s5 = sand.u32 1, %s2978_s23  }
 0x122   : > { %s535_s28 = sshll.u32 %s528_s10, 4  ;;  %s3449_s11 = scalar_lea.sflag [#allocation6], %s3842_s5  ;;  %s3445_s28 = int_to_ptr.vmem [resolvable:$true] %s535_s28 }
 0x123   : > { %p2808_p7 = pneg %p3408_p12 }
 0x126   : > { %s3443_s20 = scalar_lea.hbm %s3841_s13, %s2139_s25  ;;  %s2811_s14 = scalar_lea.hbm %s3841_s13, 512 }
 0x127   : > { %s2806_s3 = scalar_lea.hbm %s3443_s20, 256  ;;  %p2812_p1 = scmp.lt.u32.totalorder %s3443_s20, %s3841_s13 }
 0x128   : > { %p2807_p2 = scmp.ne.s32.totalorder %s3443_s20, %s2806_s3  ;;  %p2813_p9 = scmp.lt.u32.totalorder %s2811_s14, %s2806_s3 }
 0x129   : > { %p2815_p13 = scmp.lt.u32.totalorder %s2806_s3, %s3443_s20 }
 0x12a   : > { %p2809_p0 = pnand %p2808_p7, %p2807_p2  ;;  %p2814_p10 = por %p2813_p9, %p2812_p1 }
 0x12c   : > { %p2810_p6 = pneg %p2809_p0  ;;  %p2816_p8 = por %p2815_p13, %p2814_p10 }
 0x12e   : > { %p2817_p5 = pnand %p2816_p8, %p2810_p6 }
 0x130   : > { %2820 = shalt.err (!%p2817_p5)
}
 0x131   : > { %s2821_s5 = scalar_lea.vmem %s3445_s28, 256  ;;  %s2990_s25 = smov [#allocation5]  }
 0x132   : > { %p2822_p4 = scmp.ne.s32.totalorder %s3445_s28, %s2821_s5  ;;  %s2826_s27 = sshll.u32 %s2990_s25, 4  ;;  %s2827_s27 = int_to_ptr.vmem [resolvable:$false] %s2826_s27 }
 0x133   : > { %s2828_s10 = scalar_lea.vmem %s2827_s27, 512  ;;  %p2829_p2 = scmp.lt.s32.totalorder %s3445_s28, %s2827_s27 }
 0x134   : > { %p2824_p3 = pnand %p2822_p4, %p2808_p7  ;;  %p2830_p0 = scmp.lt.s32.totalorder %s2828_s10, %s2821_s5 }
 0x136   : > { %p2825_p11 = pneg %p2824_p3  ;;  %p2831_p1 = por %p2830_p0, %p2829_p2 }
 0x138   : > { %p2832_p9 = pnand %p2831_p1, %p2825_p11 }
 0x13a   : > { %2835 = shalt.err (!%p2832_p9)
}
 0x13b   : > { %s2991_s3 = smov 128   ;;  %s2992_s8 = smov 8  }
 0x13c   : > { %2400 = dma.hbm_to_vmem [thread:$0]  (!%p3408_p12), %s3443_s20, 256, %s3445_s28, %s3449_s11, %s2991_s3, %s2991_s3, %s2992_s8  }
 0x13d   : > { %s3843_s4 = sld [smem:[#allocation29_spill]] }
 0x143   : > { %p3844_p7 = scmp.ne.s32.totalorder %s3843_s4, 0 }
 0x144   : > { %s3480_s14 = sand.u32 (!%p3844_p7), 1, %s2954_s17   ;;  %p3845_p6 = scmp.ne.s32.totalorder (!%p3844_p7), %s3832_s12, 0 }
 0x145   : > { %547 = sbr.rel (%p3844_p7) target bundleno = 4493 (0x118d), region = 76  ;;  %s2072_s9 = sshll.u32 (!%p3844_p7), %s3480_s14, 3 }
 0x146   : > { %s550_s6 = scalar_lea.sflag (!%p3844_p7), [#allocation3], %s3480_s14  ;;  %s3486_s5 = scalar_lea.vmem (!%p3844_p7), [#allocation2], %s2072_s9 }
 0x14c   : > { %2909 = dma.done.wait (%p3845_p6), %s550_s6, 128  }
 0x14d   : > { %2911 = vsyncadd (%p3845_p6), %s550_s6, 4294967168  ;;  %s3846_s11 = sld [smem:[#allocation28_spill]]  ;;  %s560_s20 = sand.u32 1, %s2942_s30  }
 0x14e   : > { %s3494_s28 = sshll.u32 %s560_s20, 4  ;;  %p3847_p12 = scmp.ne.s32.totalorder %s3835_s29, 0 }
 0x14f   : > { %s562_s27 = scalar_lea.vmem [#allocation5], %s3494_s28 }
 0x153   : > { %s558_s24 = sand.u32 1, %s3846_s11  }
 0x154   : > { %s559_s25 = scalar_lea.sflag [#allocation6], %s558_s24 }
 0x155   : > { %2913 = dma.done.wait (%p3847_p12), %s559_s25, 256  }
 0x156   : > { %2915 = vsyncadd (%p3847_p12), %s559_s25, 4294967040  ;;  %p3848_p10 = scmp.eq.s32.totalorder %s3846_s11, 0 }
 0x158   : > { %2917 = dma.done.wait (%p3848_p10), [#allocation6], 512   ;;  %p3849_p13 = pmov %p3848_p10 }
 0x159   : > { %p3850_p8 = pmov %p3848_p10 }
 0x15a   : > { %2919 = vsyncadd (%p3849_p13), [#allocation6], 4294966784 }
 0x15b   : > { %2921 = dma.done.wait (%p3850_p8), [#allocation9], 1024   ;;  %p3851_p5 = pmov %p3850_p8 }
 0x15d   : > { %2923 = vsyncadd (%p3851_p5), [#allocation9], 4294966272  ;;  %p3852_p4 = pmov %p3851_p5 }
 0x15f   : > { %2925 = dma.done.wait (%p3852_p4), [#allocation12], 528   ;;  %p3853_p3 = pmov %p3852_p4 }
 0x161   : > { %2927 = vsyncadd (%p3853_p3), [#allocation12], 4294966768  ;;  %p3854_p11 = pmov %p3853_p3 }
 0x162   : > { %p3855_p2 = pmov %p3853_p3 }
 0x163   : > { %2929 = dma.done.wait (%p3854_p11), [#allocation15], 1024  }
 0x164   : > { %2931 = vsyncadd (%p3855_p2), [#allocation15], 4294966272  ;;  %v2993_v0 = vmov 0.0   ;;  %vm2994_vm0 = vmmov 0   ;;  %v2526_v1 = vld [vmem:[#allocation8] sm:$0xff]   ;;  %v2527_v2 = vld [vmem:[#allocation8 + $0x8] sm:$0xff]   ;;  %v904_v29 = vlaneseq }
 0x165   : > { %2206 = vmatprep.subr.bf16.mxu1 %v2993_v0  ;;  %2194 = vmatprep.subr.bf16.mxu0 %v2993_v0  ;;  %v2528_v3 = vld [vmem:[#allocation7] sm:$0xff]   ;;  %v2530_v4 = vld [vmem:[#allocation7 + $0x8] sm:$0xff]   ;;  %v2529_v5 = vld [vmem:[#allocation8 + $0x10] sm:$0xff]   ;;  %vm648_vm1 = vcmask 523264   ;;  %vm923_vm2 = vcmask 130048   ;;  %s2995_s12 = smov 112  }
 0x166   : > { %2214 = vmatprep.mubr.msk.bf16.mxu1 %vm2994_vm0, %v2993_v0  ;;  %2202 = vmatprep.mubr.msk.bf16.mxu0 %vm2994_vm0, %v2993_v0  ;;  %v2531_v6 = vld [vmem:[#allocation8 + $0x18] sm:$0xff]   ;;  %v642_v7 = vld [vmem:[%s562_s27] sm:$0xff]  ;;  %s3856_s29 = sld [smem:[#allocation26_spill]]  ;;  %v2535_v26 = vld [vmem:[#allocation10 + $0x8] sm:$0xff]   ;;  %v905_v30 = vshrl.u32 %v904_v29, 7  ;;  %v909_v33 = vand.u32 127, %v904_v29 }
 0x167   : > { %2207 = vmatpush3.bf16.msra.mxu1 %v2526_v1  ;;  %2195 = vmatpush3.bf16.msra.mxu0 %v2528_v3  ;;  %v643_v8 = vld [vmem:[%s562_s27 + $0x8] sm:$0xff]  ;;  %v2532_v9 = vld [vmem:[#allocation7 + $0x10] sm:$0xff]   ;;  %v2534_v25 = vld [vmem:[#allocation10] sm:$0xff]   ;;  %v2996_v35 = vmov -1e+30   ;;  %s2997_s3 = smov 96  }
 0x168   : > { %2208 = vmatprep.subr.bf16.mxu1 %v2993_v0  ;;  %2196 = vmatprep.subr.bf16.mxu0 %v2993_v0  ;;  %v2533_v10 = vld [vmem:[#allocation7 + $0x18] sm:$0xff]   ;;  %v678_v12 = vpack.c.bf16 %v643_v8, %v642_v7  ;;  %v2536_v27 = vld [vmem:[#allocation10 + $0x10] sm:$0xff]   ;;  %s2998_s8 = smov 80   ;;  %s3858_s20 = sld [smem:[#allocation39_spill]] }
 0x169   : > { %v3532_v11 = vld [vmem:[%s3486_s5] sm:$0xff]  ;;  %s3857_s5 = sld [smem:[#allocation36_spill]]  ;;  %s3861_s11 = sld [smem:[#allocation27_spill]] }
 0x16a   : > { %v677_v13 = vpack.c.bf16 %v3532_v11, %v3532_v11  ;;  %v2537_v28 = vld [vmem:[#allocation10 + $0x18] sm:$0xff]   ;;  %s3862_s25 = sld [smem:[#allocation42_spill]]  ;;  %s639_s6 = scalar_lea.vmem [#allocation17], %s2072_s9 }
 0x16b   : > { %2209 = vmatpush3.bf16.msra.mxu1 %v2527_v2  ;;  %2197 = vmatpush3.bf16.msra.mxu0 %v2530_v4  ;;  %p3866_p1 = scmp.ne.s32.totalorder %s3836_s26, 0  ;;  %s2999_s9 = smov [#allocation17]  }
 0x16c   : > { %2210 = vmatprep.subr.bf16.mxu1 %v2993_v0  ;;  %2198 = vmatprep.subr.bf16.mxu0 %v2993_v0  ;;  %s2099_s10 = sshll.u32 %s3856_s29, 3 }
 0x16d   : > { %v906_v31 = vstv %s2099_s10 }
 0x16e   : > { %v907_v32 = vadd.s32 %v906_v31, %v905_v30  ;;  %s3859_s28 = smov %s3858_s20 }
 0x16f   : > { %2211 = vmatpush3.bf16.msra.mxu1 %v2529_v5  ;;  %2199 = vmatpush3.bf16.msra.mxu0 %v2532_v9  ;;  %s2135_s27 = sshll.u32 %s3861_s11, 1 }
 0x170   : > { %2212 = vmatprep.subr.bf16.mxu1 %v2993_v0  ;;  %2200 = vmatprep.subr.bf16.mxu0 %v2993_v0  ;;  %vm910_vm3 = vcmp.le.s32.totalorder %v909_v33, %v907_v32 }
 0x171   : > { %v3569_v36 = vsel %vm910_vm3, 0.0, %v2996_v35 }
 0x173   : > { %2213 = vmatpush3.bf16.msra.mxu1 %v2531_v6  ;;  %2201 = vmatpush3.bf16.msra.mxu0 %v2533_v10 }
 0x174   : > { %2230 = vmatprep.subr.bf16.mxu1 %v2993_v0  ;;  %2218 = vmatprep.subr.bf16.mxu0 %v2993_v0 }
 0x176   : > { %2215 = vmatmul.mubr.msk.bf16.vlgmr.msra.gmra.mrb[0].mxu1 %vm648_vm1, %v678_v12  ;;  %2203 = vmatmul.mubr.msk.bf16.vlgmr.msra.gmra.mrb[0].mxu0 %vm648_vm1, %v677_v13 }
 0x177   : > { %2232 = vmatprep.mubr.msk.bf16.mxu1 %vm2994_vm0, %v2993_v0  ;;  %2226 = vmatprep.mubr.msk.bf16.mxu0 %vm2994_vm0, %v2993_v0 }
 0x178   : > { %2219 = vmatpush3.bf16.msra.mxu0 %v2534_v25 }
 0x179   : > { %2220 = vmatprep.subr.bf16.mxu0 %v2993_v0 }
 0x17c   : > { %2221 = vmatpush3.bf16.msra.mxu0 %v2535_v26 }
 0x17d   : > { %2222 = vmatprep.subr.bf16.mxu0 %v2993_v0 }
 0x180   : > { %2223 = vmatpush3.bf16.msra.mxu0 %v2536_v27 }
 0x181   : > { %2224 = vmatprep.subr.bf16.mxu0 %v2993_v0 }
 0x184   : > { %2225 = vmatpush3.bf16.msra.mxu0 %v2537_v28 }
 0x185   : > { %2254 = vmatprep.subr.bf16.mxu0 %v2993_v0 }
 0x187   : > { %2227 = vmatmul.mubr.msk.bf16.vlgmr.msra.gmra.mrb[4].mxu0 %vm648_vm1, %v678_v12 }
 0x188   : > { %2256 = vmatprep.mubr.msk.bf16.mxu0 %vm2994_vm0, %v2993_v0 }
 0x249   : > { %v823_v14 = vpop.f32.mrb[0].mxu1  ;;  %v748_v17 = vpop.f32.mrb[0].mxu0 }
 0x24a   : > { %v2216_v15 = vpop.f32.mrb[1].mxu1  ;;  %v2204_v20 = vpop.f32.mrb[1].mxu0  ;;  %v3552_v23 = vpack.c.bf16 %v748_v17, %v748_v17 }
 0x24b   : > { %v826_v16 = vpop.f32.mrb[2].mxu1  ;;  %v751_v21 = vpop.f32.mrb[2].mxu0  ;;  %v2539_v15 = vld [vmem:[#allocation11 + $0x8] sm:$0xff]   ;;  %v2538_v20 = vld [vmem:[#allocation11] sm:$0xff]  }
 0x24c   : > { %v3546_v18 = vpack.c.bf16 %v826_v16, %v823_v14  ;;  %v2217_v19 = vpop.f32.mrb[3].mxu1  ;;  %v2205_v24 = vpop.f32.mrb[3].mxu0  ;;  %2255 = vmatpush3.bf16.msra.mxu0 %v2539_v15 }
 0x24d   : > { %2266 = vmatprep.subr.bf16.mxu0 %v2993_v0 }
 0x24e   : > { %1032 = vrot.lane.b32.xlu1 %v3546_v18, %s2995_s12  ;;  %v928_v22 = vsel %vm923_vm2, %v3546_v18, 0 }
 0x24f   : > { %2231 = vmatpush3.bf16.xpose.msra.mxu1 %v928_v22 }
 0x250   : > { %2236 = vmatprep.subr.bf16.mxu1 %v2993_v0 }
 0x252   : > { %1029 = vrot.lane.b32.xlu1 %v3552_v23, %s2995_s12 }
 0x256   : > { %2233 = vmatmul.mubr.msk.bf16.vlgmr.msra.gmra.mrb[4].mxu1 %vm923_vm2, %v3552_v23 }
 0x257   : > { %2238 = vmatprep.mubr.msk.bf16.mxu1 %vm2994_vm0, %v2993_v0 }
 0x25a   : > { %v896_v48 = vpop.f32.mrb[4].mxu0 }
 0x25b   : > { %v2228_v49 = vpop.f32.mrb[5].mxu0 }
 0x25c   : > { %v899_v50 = vpop.f32.mrb[6].mxu0 }
 0x25d   : > { %v2229_v51 = vpop.f32.mrb[7].mxu0  ;;  %v3574_v52 = vpack.c.bf16 %v899_v50, %v896_v48 }
 0x25f   : > { %2237 = vmatpush3.bf16.msra.mxu1 %v3574_v52 }
 0x260   : > { %2242 = vmatprep.subr.bf16.mxu1 %v2993_v0 }
 0x2c0   : > { %v1033_v56 = vpop.permute.xlu1 %1032 }
 0x2c1   : > { %v1038_v58 = vsel %vm923_vm2, %v1033_v56, 0 }
 0x2c4   : > { %v1030_v59 = vpop.permute.xlu1 %1029 }
 0x329   : > { %v964_v34 = vpop.f32.mrb[4].mxu1 }
 0x32a   : > { %v970_v37 = vmul.f32 0.25, %v964_v34  ;;  %v2234_v38 = vpop.f32.mrb[5].mxu1 }
 0x32b   : > { %v967_v39 = vpop.f32.mrb[6].mxu1 }
 0x32c   : > { %v2235_v40 = vpop.f32.mrb[7].mxu1  ;;  %v971_v41 = vadd.f32 %v970_v37, %v3569_v36 }
 0x32e   : > { %v972_v42 = vsel %vm923_vm2, %v971_v41, -inf }
 0x32f   : > { %973 = vmax.xlane.f32.xlu0 %v972_v42 }
 0x3bc   : > { %v974_v43 = vpop.xlane.xlu0 %973 }
 0x3bd   : > { %v975_v44 = vsub.f32 %v971_v41, %v974_v43 }
 0x3bf   : > { %v976_v45 = vmul.f32 1.442695, %v975_v44 }
 0x3c1   : > { %2554 = vpow2.f32 %v976_v45 }
 0x3cb   : > { %v2555_v46 = vpop.eup %2554 }
 0x3cc   : > { %v978_v47 = vsel %vm923_vm2, %v2555_v46, 0.0 }
 0x3cd   : > { %979 = vadd.xlane.f32.xlu0 %v978_v47 }
 0x45a   : > { %v980_v53 = vpop.xlane.xlu0 %979 }
 0x45b   : > { %2556 = vrcp.f32 %v980_v53 }
 0x465   : > { %v2557_v54 = vpop.eup %2556 }
 0x466   : > { %v982_v55 = vmul.f32 %v2557_v54, %v2555_v46 }
 0x468   : > { %v983_v57 = vpack.c.bf16 %v982_v55, %v982_v55 }
 0x46a   : > { %2239 = vmatmul.mubr.msk.bf16.vlgmr.msra.gmra.mrb[8].mxu1 %vm923_vm2, %v983_v57 }
 0x46b   : > { %2243 = vmatpush3.bf16.xpose.msra.mxu1 %v1038_v58  ;;  %2244 = vmatprep.mubr.msk.bf16.mxu1 %vm2994_vm0, %v2993_v0 }
 0x46c   : > { %2248 = vmatprep.subr.bf16.mxu1 %v2993_v0 }
 0x472   : > { %2245 = vmatmul.mubr.msk.bf16.vlgmr.msra.gmra.mrb[12].mxu1 %vm923_vm2, %v1030_v59 }
 0x473   : > { %2250 = vmatprep.mubr.msk.bf16.mxu1 %vm2994_vm0, %v2993_v0 }
 0x53d   : > { %v1021_v60 = vpop.f32.mrb[8].mxu1 }
 0x53e   : > { %v2240_v61 = vpop.f32.mrb[9].mxu1  ;;  %v1027_v22 = vpack.c.bf16 %v1021_v60, %v1021_v60 }
 0x53f   : > { %v1024_v62 = vpop.f32.mrb[10].mxu1 }
 0x540   : > { %v2241_v63 = vpop.f32.mrb[11].mxu1 }
 0x545   : > { %v1074_v1 = vpop.f32.mrb[12].mxu1 }
 0x546   : > { %v1080_v2 = vmul.f32 0.25, %v1074_v1  ;;  %v2246_v3 = vpop.f32.mrb[13].mxu1 }
 0x547   : > { %v1077_v4 = vpop.f32.mrb[14].mxu1 }
 0x548   : > { %v2247_v5 = vpop.f32.mrb[15].mxu1  ;;  %v1081_v6 = vadd.f32 %v1080_v2, %v3569_v36 }
 0x54a   : > { %v1082_v7 = vsel %vm923_vm2, %v1081_v6, -inf }
 0x54b   : > { %1083 = vmax.xlane.f32.xlu0 %v1082_v7 }
 0x561   : > { %1095 = vrot.lane.b32.xlu0 %v3574_v52, %s2995_s12  ;;  %s1876_s12 = sadd.s32 %s3856_s29, %s2135_s27  ;;  %s1865_s29 = scalar_lea.sflag [#allocation4], %s3480_s14 }
 0x562   : > { %s2136_s4 = sshll.u32 %s1876_s12, 7  ;;  %s2840_s12 = sshll.u32 %s2999_s9, 4  ;;  %s2841_s12 = int_to_ptr.vmem [resolvable:$false] %s2840_s12 }
 0x563   : > { %s2842_s10 = scalar_lea.vmem %s2841_s12, 256 }
 0x565   : > { %1242 = vrot.lane.b32.xlu0 %v3546_v18, %s2997_s3 }
 0x569   : > { %1240 = vrot.lane.b32.xlu0 %v3552_v23, %s2997_s3 }
 0x5d8   : > { %v1084_v8 = vpop.xlane.xlu0 %1083 }
 0x5d9   : > { %v1085_v9 = vsub.f32 %v1081_v6, %v1084_v8 }
 0x5db   : > { %v1086_v10 = vmul.f32 1.442695, %v1085_v9 }
 0x5dc   : > { %v1096_v12 = vpop.permute.xlu0 %1095 }
 0x5dd   : > { %2558 = vpow2.f32 %v1086_v10  ;;  %2249 = vmatpush3.bf16.msra.mxu1 %v1096_v12 }
 0x5de   : > { %2260 = vmatprep.subr.bf16.mxu1 %v2993_v0 }
 0x5e0   : > { %v1243_v25 = vpop.permute.xlu0 %1242 }
 0x5e1   : > { %v1248_v30 = vsel %vm923_vm2, %v1243_v25, 0 }
 0x5e4   : > { %v1241_v34 = vpop.permute.xlu0 %1240 }
 0x5e7   : > { %v2559_v13 = vpop.eup %2558 }
 0x5e8   : > { %v1088_v14 = vsel %vm923_vm2, %v2559_v13, 0.0 }
 0x5e9   : > { %1089 = vadd.xlane.f32.xlu1 %v1088_v14 }
 0x5fa   : > { %1304 = vrot.lane.b32.xlu1 %v3574_v52, %s2997_s3 }
 0x676   : > { %v1090_v16 = vpop.xlane.xlu1 %1089 }
 0x677   : > { %2560 = vrcp.f32 %v1090_v16 }
 0x67a   : > { %v1305_v24 = vpop.permute.xlu1 %1304 }
 0x681   : > { %v2561_v17 = vpop.eup %2560 }
 0x682   : > { %v1092_v19 = vmul.f32 %v2561_v17, %v2559_v13 }
 0x684   : > { %v1093_v21 = vpack.c.bf16 %v1092_v19, %v1092_v19  ;;  %v2541_v19 = vld [vmem:[#allocation11 + $0x18] sm:$0xff]  }
 0x686   : > { %2251 = vmatmul.mubr.msk.bf16.vlgmr.msra.gmra.mrb[16].mxu1 %vm923_vm2, %v1093_v21 }
 0x687   : > { %2261 = vmatpush3.bf16.msra.mxu1 %v2538_v20  ;;  %2262 = vmatprep.mubr.msk.bf16.mxu1 %vm2994_vm0, %v2993_v0 }
 0x688   : > { %2272 = vmatprep.subr.bf16.mxu1 %v2993_v0 }
 0x68e   : > { %2263 = vmatmul.mubr.msk.bf16.vlgmr.msra.gmra.mrb[20].mxu1 %vm923_vm2, %v1027_v22 }
 0x68f   : > { %2273 = vmatpush3.bf16.msra.mxu1 %v1305_v24  ;;  %2274 = vmatprep.mubr.msk.bf16.mxu1 %vm2994_vm0, %v2993_v0 }
 0x690   : > { %2284 = vmatprep.subr.bf16.mxu1 %v2993_v0 }
 0x759   : > { %v1135_v26 = vpop.f32.mrb[16].mxu1 }
 0x75a   : > { %v1141_v27 = vpack.c.bf16 %v1135_v26, %v1135_v26  ;;  %v2252_v28 = vpop.f32.mrb[17].mxu1 }
 0x75b   : > { %v1138_v29 = vpop.f32.mrb[18].mxu1  ;;  %v649_v28 = vsel %vm648_vm1, %v3532_v11, 0.0 }
 0x75c   : > { %v2253_v31 = vpop.f32.mrb[19].mxu1  ;;  %2257 = vmatmul.mubr.msk.bf16.vlgmr.msra.gmra.mrb[8].mxu0 %vm923_vm2, %v1141_v27 }
 0x75d   : > { %2267 = vmatpush3.bf16.xpose.msra.mxu0 %v1248_v30  ;;  %2268 = vmatprep.mubr.msk.bf16.mxu0 %vm2994_vm0, %v2993_v0 }
 0x75e   : > { %2278 = vmatprep.subr.bf16.mxu0 %v2993_v0 }
 0x761   : > { %v1234_v32 = vpop.f32.mrb[20].mxu1 }
 0x762   : > { %v2264_v33 = vpop.f32.mrb[21].mxu1 }
 0x763   : > { %v1237_v35 = vpop.f32.mrb[22].mxu1 }
 0x764   : > { %v2265_v37 = vpop.f32.mrb[23].mxu1  ;;  %2269 = vmatmul.mubr.msk.bf16.vlgmr.msra.gmra.mrb[12].mxu0 %vm923_vm2, %v1241_v34 }
 0x765   : > { %2280 = vmatprep.mubr.msk.bf16.mxu0 %vm2994_vm0, %v2993_v0 }
 0x82f   : > { %v1185_v38 = vpop.f32.mrb[8].mxu0 }
 0x830   : > { %v3612_v39 = vadd.f32 %v1234_v32, %v1185_v38  ;;  %v2258_v40 = vpop.f32.mrb[9].mxu0 }
 0x831   : > { %v1188_v41 = vpop.f32.mrb[10].mxu0 }
 0x832   : > { %v2259_v42 = vpop.f32.mrb[11].mxu0 }
 0x837   : > { %v1284_v43 = vpop.f32.mrb[12].mxu0 }
 0x838   : > { %v1290_v44 = vmul.f32 0.25, %v1284_v43  ;;  %v2270_v45 = vpop.f32.mrb[13].mxu0 }
 0x839   : > { %v1287_v46 = vpop.f32.mrb[14].mxu0 }
 0x83a   : > { %v2271_v47 = vpop.f32.mrb[15].mxu0  ;;  %v1291_v48 = vadd.f32 %v1290_v44, %v3569_v36 }
 0x83c   : > { %v1292_v49 = vsel %vm923_vm2, %v1291_v48, -inf }
 0x83d   : > { %1293 = vmax.xlane.f32.xlu0 %v1292_v49 }
 0x8ca   : > { %v1294_v50 = vpop.xlane.xlu0 %1293 }
 0x8cb   : > { %v1295_v51 = vsub.f32 %v1291_v48, %v1294_v50 }
 0x8cd   : > { %v1296_v53 = vmul.f32 1.442695, %v1295_v51 }
 0x8cf   : > { %2562 = vpow2.f32 %v1296_v53  ;;  %v2542_v53 = vld [vmem:[%s3858_s20] sm:$0xff]   ;;  %s3864_s20 = sld [smem:[#allocation44_spill]] }
 0x8d5   : > { %s3703_s13 = scalar_lea.hbm %s3864_s20, %s2136_s4 }
 0x8d9   : > { %v2563_v54 = vpop.eup %2562 }
 0x8da   : > { %v1298_v55 = vsel %vm923_vm2, %v2563_v54, 0.0 }
 0x8db   : > { %1299 = vadd.xlane.f32.xlu1 %v1298_v55  ;;  %v2544_v55 = vld [vmem:[%s3859_s28 + $0x8] sm:$0xff]  }
 0x8ec   : > { %1403 = vrot.lane.b32.xlu1 %v3546_v18, %s2998_s8 }
 0x8f0   : > { %1401 = vrot.lane.b32.xlu1 %v3552_v23, %s2998_s8  ;;  %v2540_v23 = vld [vmem:[#allocation11 + $0x10] sm:$0xff]  }
 0x8f1   : > { %2279 = vmatpush3.bf16.msra.mxu0 %v2540_v23 }
 0x8f2   : > { %2290 = vmatprep.subr.bf16.mxu0 %v2993_v0 }
 0x968   : > { %v1300_v56 = vpop.xlane.xlu1 %1299 }
 0x969   : > { %2564 = vrcp.f32 %v1300_v56  ;;  %v2545_v56 = vld [vmem:[#allocation14 + $0x8] sm:$0xff]  }
 0x96c   : > { %v1404_v59 = vpop.permute.xlu1 %1403 }
 0x96d   : > { %v1409_v61 = vsel %vm923_vm2, %v1404_v59, 0  ;;  %v2548_v59 = vld [vmem:[%s3859_s28 + $0x18] sm:$0xff]  }
 0x970   : > { %v1402_v18 = vpop.permute.xlu1 %1401 }
 0x973   : > { %v2565_v57 = vpop.eup %2564 }
 0x974   : > { %v1302_v58 = vmul.f32 %v2565_v57, %v2563_v54  ;;  %v2543_v54 = vld [vmem:[#allocation14] sm:$0xff]  }
 0x975   : > { %v2546_v57 = vld [vmem:[%s3859_s28 + $0x10] sm:$0xff]  }
 0x976   : > { %v1303_v60 = vpack.c.bf16 %v1302_v58, %v1302_v58  ;;  %v2547_v58 = vld [vmem:[#allocation14 + $0x10] sm:$0xff]  }
 0x978   : > { %2275 = vmatmul.mubr.msk.bf16.vlgmr.msra.gmra.mrb[24].mxu1 %vm923_vm2, %v1303_v60  ;;  %v2549_v60 = vld [vmem:[#allocation14 + $0x18] sm:$0xff]  }
 0x979   : > { %2285 = vmatpush3.bf16.xpose.msra.mxu1 %v1409_v61  ;;  %2286 = vmatprep.mubr.msk.bf16.mxu1 %vm2994_vm0, %v2993_v0 }
 0x97a   : > { %2296 = vmatprep.subr.bf16.mxu1 %v2993_v0 }
 0x980   : > { %2287 = vmatmul.mubr.msk.bf16.vlgmr.msra.gmra.mrb[28].mxu1 %vm923_vm2, %v1402_v18 }
 0x981   : > { %2298 = vmatprep.mubr.msk.bf16.mxu1 %vm2994_vm0, %v2993_v0  ;;  %2297 = vmatpush3.bf16.msra.mxu1 %v2541_v19  ;;  %v2552_v19 = vld [vmem:[#allocation16 + $0x10] sm:$0xff]  }
 0x982   : > { %2314 = vmatprep.subr.bf16.mxu1 %v2993_v0 }
 0xa4b   : > { %v1344_v62 = vpop.f32.mrb[24].mxu1 }
 0xa4c   : > { %v1350_v63 = vpack.c.bf16 %v1344_v62, %v1344_v62  ;;  %v2276_v1 = vpop.f32.mrb[25].mxu1 }
 0xa4d   : > { %v1347_v2 = vpop.f32.mrb[26].mxu1 }
 0xa4e   : > { %v2277_v3 = vpop.f32.mrb[27].mxu1  ;;  %2281 = vmatmul.mubr.msk.bf16.vlgmr.msra.gmra.mrb[16].mxu0 %vm923_vm2, %v1350_v63 }
 0xa4f   : > { %2292 = vmatprep.mubr.msk.bf16.mxu0 %vm2994_vm0, %v2993_v0 }
 0xa53   : > { %v1445_v4 = vpop.f32.mrb[28].mxu1 }
 0xa54   : > { %v1451_v5 = vmul.f32 0.25, %v1445_v4  ;;  %v2288_v6 = vpop.f32.mrb[29].mxu1 }
 0xa55   : > { %v1448_v7 = vpop.f32.mrb[30].mxu1 }
 0xa56   : > { %v2289_v8 = vpop.f32.mrb[31].mxu1  ;;  %v1452_v9 = vadd.f32 %v1451_v5, %v3569_v36 }
 0xa57   : > { %v2083_v8 = vld [vmem:[#allocation13] ss:$0 sm:$0xff] }
 0xa58   : > { %v1453_v10 = vsel %vm923_vm2, %v1452_v9, -inf }
 0xa59   : > { %1454 = vmax.xlane.f32.xlu0 %v1453_v10 }
 0xa6f   : > { %1465 = vrot.lane.b32.xlu0 %v3574_v52, %s2998_s8  ;;  %s3863_s8 = sld [smem:[#allocation43_spill]] }
 0xa8e   : > { %650 = vadd.xlane.f32.xlu0 %v649_v28 }
 0xae6   : > { %v1455_v12 = vpop.xlane.xlu0 %1454 }
 0xae7   : > { %v1456_v13 = vsub.f32 %v1452_v9, %v1455_v12 }
 0xae9   : > { %v1457_v14 = vmul.f32 1.442695, %v1456_v13 }
 0xaea   : > { %v1466_v15 = vpop.permute.xlu0 %1465 }
 0xaeb   : > { %2566 = vpow2.f32 %v1457_v14  ;;  %2291 = vmatpush3.bf16.msra.mxu0 %v1466_v15 }
 0xaec   : > { %2302 = vmatprep.subr.bf16.mxu0 %v2993_v0 }
 0xaf5   : > { %v2567_v16 = vpop.eup %2566 }
 0xaf6   : > { %v1459_v17 = vsel %vm923_vm2, %v2567_v16, 0.0 }
 0xaf7   : > { %1460 = vadd.xlane.f32.xlu1 %v1459_v17  ;;  %v2551_v17 = vld [vmem:[#allocation16 + $0x8] sm:$0xff]  }
 0xb1b   : > { %v651_v34 = vpop.xlane.xlu0 %650 }
 0xb1c   : > { %v653_v35 = vmul.f32 0.015625, %v651_v34 }
 0xb1e   : > { %v654_v37 = vsub.f32 %v3532_v11, %v653_v35 }
 0xb20   : > { %v655_v45 = vmul.f32 %v654_v37, %v654_v37 }
 0xb21   : > { %v1394_v36 = vpop.f32.mrb[16].mxu0 }
 0xb22   : > { %v1400_v20 = vadd.f32 %v1394_v36, %v3612_v39  ;;  %v2282_v52 = vpop.f32.mrb[17].mxu0  ;;  %v2116_v39 = vld [vmem:[%s3857_s5] ss:$0 sm:$0xff]  ;;  %v656_v47 = vsel %vm648_vm1, %v655_v45, 0.0  ;;  %s3860_s5 = sld [smem:[#allocation37_spill]]  ;;  %v2553_v36 = vld [vmem:[#allocation16 + $0x18] sm:$0xff]  }
 0xb23   : > { %v1397_v21 = vpop.f32.mrb[18].mxu0 }
 0xb24   : > { %v2283_v22 = vpop.f32.mrb[19].mxu0 }
 0xb28   : > { %v2082_v4 = vld [vmem:[%s3860_s5] ss:$0 sm:$0xff]  ;;  %s1880_s5 = sshll.u32 %s639_s6, 4  ;;  %s3705_s5 = int_to_ptr.vmem [resolvable:$true] %s1880_s5 }
 0xb29   : > { %s2836_s27 = scalar_lea.vmem %s3705_s5, 128  ;;  %p2843_p6 = scmp.lt.s32.totalorder %s3705_s5, %s2841_s12 }
 0xb2a   : > { %p2837_p0 = scmp.ne.s32.totalorder %s3705_s5, %s2836_s27  ;;  %p2844_p12 = scmp.lt.s32.totalorder %s2842_s10, %s2836_s27 }
 0xb2c   : > { %p2838_p9 = pnand %p2837_p0, %p3866_p1  ;;  %p2845_p10 = por %p2844_p12, %p2843_p6 }
 0xb2e   : > { %p2839_p7 = pneg %p2838_p9 }
 0xb30   : > { %p2846_p13 = pnand %p2845_p10, %p2839_p7 }
 0xb84   : > { %v1461_v24 = vpop.xlane.xlu1 %1460 }
 0xb85   : > { %2568 = vrcp.f32 %v1461_v24 }
 0xb8f   : > { %v2569_v25 = vpop.eup %2568 }
 0xb90   : > { %v1463_v26 = vmul.f32 %v2569_v25, %v2567_v16  ;;  %v2550_v16 = vld [vmem:[#allocation16] sm:$0xff]  }
 0xb92   : > { %v1464_v27 = vpack.c.bf16 %v1463_v26, %v1463_v26 }
 0xb94   : > { %2293 = vmatmul.mubr.msk.bf16.vlgmr.msra.gmra.mrb[20].mxu0 %vm923_vm2, %v1464_v27 }
 0xb95   : > { %2310 = vmatprep.mubr.msk.bf16.mxu0 %vm2994_vm0, %v2993_v0  ;;  %2303 = vmatpush3.bf16.msra.mxu0 %v2542_v53 }
 0xb96   : > { %2304 = vmatprep.subr.bf16.mxu0 %v2993_v0 }
 0xb99   : > { %2305 = vmatpush3.bf16.msra.mxu0 %v2544_v55 }
 0xb9a   : > { %2306 = vmatprep.subr.bf16.mxu0 %v2993_v0 }
 0xb9d   : > { %2307 = vmatpush3.bf16.msra.mxu0 %v2546_v57 }
 0xb9e   : > { %2308 = vmatprep.subr.bf16.mxu0 %v2993_v0 }
 0xba1   : > { %2309 = vmatpush3.bf16.msra.mxu0 %v2548_v59 }
 0xba2   : > { %2326 = vmatprep.subr.bf16.mxu0 %v2993_v0 }
 0xc67   : > { %v1505_v29 = vpop.f32.mrb[20].mxu0 }
 0xc68   : > { %v1511_v30 = vpack.c.bf16 %v1505_v29, %v1505_v29  ;;  %v2294_v31 = vpop.f32.mrb[21].mxu0 }
 0xc69   : > { %v1508_v32 = vpop.f32.mrb[22].mxu0 }
 0xc6a   : > { %v2295_v33 = vpop.f32.mrb[23].mxu0  ;;  %2299 = vmatmul.mubr.msk.bf16.vlgmr.msra.gmra.mrb[32].mxu1 %vm923_vm2, %v1511_v30 }
 0xc6b   : > { %2322 = vmatprep.mubr.msk.bf16.mxu1 %vm2994_vm0, %v2993_v0  ;;  %2315 = vmatpush3.bf16.msra.mxu1 %v2543_v54 }
 0xc6c   : > { %2316 = vmatprep.subr.bf16.mxu1 %v2993_v0 }
 0xc6f   : > { %2317 = vmatpush3.bf16.msra.mxu1 %v2545_v56 }
 0xc70   : > { %2318 = vmatprep.subr.bf16.mxu1 %v2993_v0 }
 0xc73   : > { %2319 = vmatpush3.bf16.msra.mxu1 %v2547_v58 }
 0xc74   : > { %2320 = vmatprep.subr.bf16.mxu1 %v2993_v0 }
 0xc77   : > { %2321 = vmatpush3.bf16.msra.mxu1 %v2549_v60 }
 0xd3d   : > { %v1555_v38 = vpop.f32.mrb[32].mxu1 }
 0xd3e   : > { %v1561_v40 = vadd.f32 %v1555_v38, %v1400_v20  ;;  %v2300_v41 = vpop.f32.mrb[33].mxu1 }
 0xd3f   : > { %v1558_v42 = vpop.f32.mrb[34].mxu1 }
 0xd40   : > { %v2301_v43 = vpop.f32.mrb[35].mxu1  ;;  %v1569_v44 = vadd.f32 %v2116_v39, %v1561_v40 }
 0xd42   : > { %v1570_v46 = vsel %vm648_vm1, %v1569_v44, 0.0 }
 0xd43   : > { %1571 = vadd.xlane.f32.xlu1 %v1570_v46 }
 0xd47   : > { %657 = vadd.xlane.f32.xlu1 %v656_v47 }
 0xdd0   : > { %v1572_v48 = vpop.xlane.xlu1 %1571 }
 0xdd1   : > { %v1573_v49 = vmul.f32 0.015625, %v1572_v48 }
 0xdd3   : > { %v1574_v11 = vsub.f32 %v1569_v44, %v1573_v49 }
 0xdd4   : > { %v658_v61 = vpop.xlane.xlu1 %657 }
 0xdd5   : > { %v1575_v50 = vmul.f32 %v1574_v11, %v1574_v11  ;;  %v659_v18 = vmul.f32 0.015625, %v658_v61 }
 0xdd7   : > { %v1576_v51 = vsel %vm648_vm1, %v1575_v50, 0.0  ;;  %v660_v23 = vadd.f32 1e-05, %v659_v18  ;;  %v2117_v18 = vld [vmem:[%s3862_s25] ss:$0 sm:$0xff]  ;;  %s3865_s25 = smov %s3864_s20 }
 0xdd8   : > { %1577 = vadd.xlane.f32.xlu1 %v1576_v51 }
 0xdd9   : > { %2570 = vrsqrt.f32 %v660_v23 }
 0xde3   : > { %v2571_v2 = vpop.eup %2570 }
 0xde4   : > { %v662_v3 = vmul.f32 %v2571_v2, %v654_v37 }
 0xde6   : > { %v669_v6 = vmul.f32 %v2082_v4, %v662_v3 }
 0xde8   : > { %v676_v10 = vadd.f32 %v2083_v8, %v669_v6 }
 0xe65   : > { %v1578_v62 = vpop.xlane.xlu1 %1577 }
 0xe66   : > { %v1579_v63 = vmul.f32 0.015625, %v1578_v62 }
 0xe68   : > { %v1580_v1 = vadd.f32 1e-05, %v1579_v63 }
 0xe6a   : > { %2572 = vrsqrt.f32 %v1580_v1  ;;  %v2118_v1 = vld [vmem:[%s3863_s8] ss:$0 sm:$0xff] }
 0xe74   : > { %v2573_v5 = vpop.eup %2572 }
 0xe75   : > { %v1582_v7 = vmul.f32 %v2573_v5, %v1574_v11 }
 0xe77   : > { %v1583_v9 = vmul.f32 %v2082_v4, %v1582_v7 }
 0xe79   : > { %v1584_v12 = vadd.f32 %v2083_v8, %v1583_v9 }
 0xe7b   : > { %v1585_v13 = vadd.f32 %v1584_v12, %v676_v10 }
 0xe7d   : > { %v1586_v14 = vsel %vm648_vm1, %v1585_v13, 0.0  ;;  %v1613_v15 = vpack.c.bf16 %v1585_v13, %v1585_v13 }
 0xe7e   : > { %1587 = vadd.xlane.f32.xlu1 %v1586_v14 }
 0xe7f   : > { %2311 = vmatmul.mubr.msk.bf16.vlgmr.msra.gmra.mrb[24].mxu0 %vm648_vm1, %v1613_v15  ;;  %2323 = vmatmul.mubr.msk.bf16.vlgmr.msra.gmra.mrb[36].mxu1 %vm648_vm1, %v1613_v15 }
 0xe80   : > { %2334 = vmatprep.mubr.msk.bf16.mxu0 %vm2994_vm0, %v2993_v0  ;;  %2327 = vmatpush3.bf16.msra.mxu0 %v2550_v16 }
 0xe81   : > { %2328 = vmatprep.subr.bf16.mxu0 %v2993_v0 }
 0xe84   : > { %2329 = vmatpush3.bf16.msra.mxu0 %v2551_v17 }
 0xe85   : > { %2330 = vmatprep.subr.bf16.mxu0 %v2993_v0 }
 0xe88   : > { %2331 = vmatpush3.bf16.msra.mxu0 %v2552_v19 }
 0xe89   : > { %2332 = vmatprep.subr.bf16.mxu0 %v2993_v0 }
 0xe8c   : > { %2333 = vmatpush3.bf16.msra.mxu0 %v2553_v36 }
 0xf0b   : > { %v1588_v39 = vpop.xlane.xlu1 %1587 }
 0xf0c   : > { %v1589_v40 = vmul.f32 0.015625, %v1588_v39 }
 0xf0e   : > { %v1590_v41 = vsub.f32 %v1585_v13, %v1589_v40 }
 0xf10   : > { %v1591_v45 = vmul.f32 %v1590_v41, %v1590_v41 }
 0xf12   : > { %v1592_v48 = vsel %vm648_vm1, %v1591_v45, 0.0 }
 0xf52   : > { %v1683_v20 = vpop.f32.mrb[24].mxu0  ;;  %v1764_v52 = vpop.f32.mrb[36].mxu1 }
 0xf53   : > { %v1690_v21 = vmul.f32 0.044715, %v1683_v20  ;;  %v2312_v22 = vpop.f32.mrb[25].mxu0  ;;  %v2324_v24 = vpop.f32.mrb[37].mxu1  ;;  %v1689_v34 = vmul.f32 0.5, %v1683_v20 }
 0xf54   : > { %v1686_v25 = vpop.f32.mrb[26].mxu0  ;;  %v1767_v26 = vpop.f32.mrb[38].mxu1 }
 0xf55   : > { %v1691_v27 = vmul.f32 %v1690_v21, %v1683_v20  ;;  %v2313_v28 = vpop.f32.mrb[27].mxu0  ;;  %v2325_v29 = vpop.f32.mrb[39].mxu1 }
 0xf57   : > { %v1692_v30 = vmul.f32 %v1691_v27, %v1683_v20 }
 0xf59   : > { %v1693_v31 = vadd.f32 %v1692_v30, %v1683_v20 }
 0xf5b   : > { %v1694_v32 = vmul.f32 0.7978846, %v1693_v31 }
 0xf5d   : > { %2574 = vtanh.f32 %v1694_v32 }
 0xf67   : > { %v2575_v33 = vpop.eup %2574 }
 0xf68   : > { %v1696_v35 = vadd.f32 1.0, %v2575_v33 }
 0xf6a   : > { %v1697_v0 = vmul.f32 %v1696_v35, %v1689_v34 }
 0xf6c   : > { %v1770_v37 = vmul.f32 %v1764_v52, %v1697_v0 }
 0xf6e   : > { %v1771_v38 = vpack.c.bf16 %v1770_v37, %v1770_v37 }
 0xf70   : > { %2335 = vmatmul.mubr.msk.bf16.vlgmr.msra.gmra.mrb[28].mxu0 %vm648_vm1, %v1771_v38 }
0x1043   : > { %v1841_v42 = vpop.f32.mrb[28].mxu0 }
0x1044   : > { %v2336_v43 = vpop.f32.mrb[29].mxu0  ;;  %v1847_v44 = vsel %vm648_vm1, %v1841_v42, 0.0 }
0x1045   : > { %v1844_v46 = vpop.f32.mrb[30].mxu0  ;;  %1848 = vadd.xlane.f32.xlu1 %v1847_v44 }
0x1046   : > { %v2337_v47 = vpop.f32.mrb[31].mxu0 }
0x1049   : > { %1593 = vadd.xlane.f32.xlu1 %v1592_v48 }
0x10d2   : > { %v1849_v49 = vpop.xlane.xlu1 %1848 }
0x10d3   : > { %v1850_v11 = vmul.f32 0.015625, %v1849_v49 }
0x10d5   : > { %v1851_v50 = vsub.f32 %v1841_v42, %v1850_v11 }
0x10d6   : > { %v1594_v54 = vpop.xlane.xlu1 %1593 }
0x10d7   : > { %v1852_v51 = vmul.f32 %v1851_v50, %v1851_v50  ;;  %v1595_v55 = vmul.f32 0.015625, %v1594_v54 }
0x10d9   : > { %v1853_v53 = vsel %vm648_vm1, %v1852_v51, 0.0  ;;  %v1596_v56 = vadd.f32 1e-05, %v1595_v55 }
0x10da   : > { %1854 = vadd.xlane.f32.xlu0 %v1853_v53 }
0x10db   : > { %2576 = vrsqrt.f32 %v1596_v56 }
0x10e5   : > { %v2577_v60 = vpop.eup %2576 }
0x10e6   : > { %v1598_v61 = vmul.f32 %v2577_v60, %v1590_v41 }
0x10e8   : > { %v1605_v62 = vmul.f32 %v2117_v18, %v1598_v61 }
0x10ea   : > { %v1612_v3 = vadd.f32 %v2118_v1, %v1605_v62 }
0x1167   : > { %v1855_v57 = vpop.xlane.xlu0 %1854 }
0x1168   : > { %v1856_v58 = vmul.f32 0.015625, %v1855_v57 }
0x116a   : > { %v1857_v59 = vadd.f32 1e-05, %v1856_v58 }
0x116c   : > { %2578 = vrsqrt.f32 %v1857_v59 }
0x1176   : > { %v2579_v23 = vpop.eup %2578 }
0x1177   : > { %v1859_v63 = vmul.f32 %v2579_v23, %v1851_v50 }
0x1179   : > { %v1860_v2 = vmul.f32 %v2117_v18, %v1859_v63 }
0x117b   : > { %v1861_v4 = vadd.f32 %v2118_v1, %v1860_v2 }
0x117d   : > { %v1862_v5 = vadd.f32 %v1861_v4, %v1612_v3 }
0x117f   : > { %1863 = vst.msk [vmem:[%s639_s6] sm:$0xff] %vm648_vm1, %v1862_v5 }
0x1180   : > { %2849 = shalt.err (!%p2846_p13)
}
0x1181   : > { %s2850_s14 = scalar_lea.hbm %s3703_s13, 128  ;;  %s2854_s4 = scalar_lea.hbm %s3865_s25, 512 }
0x1182   : > { %p2851_p8 = scmp.ne.s32.totalorder %s3703_s13, %s2850_s14  ;;  %p2855_p3 = scmp.lt.u32.totalorder %s3703_s13, %s3865_s25 }
0x1183   : > { %p2856_p11 = scmp.lt.u32.totalorder %s2854_s4, %s2850_s14  ;;  %p2858_p0 = scmp.lt.u32.totalorder %s2850_s14, %s3703_s13 }
0x1184   : > { %p2852_p5 = pnand %p2851_p8, %p3866_p1 }
0x1185   : > { %p2857_p2 = por %p2856_p11, %p2855_p3 }
0x1186   : > { %p2853_p4 = pneg %p2852_p5 }
0x1187   : > { %p2859_p9 = por %p2858_p0, %p2857_p2 }
0x1189   : > { %p2860_p7 = pnand %p2859_p9, %p2853_p4 }
0x118b   : > { %2863 = shalt.err (!%p2860_p7)
}
0x118c   : > { %2370 = dma.vmem_to_hbm [thread:$0]  (%p3866_p1), %s3705_s5, 128, %s3703_s13, %s1865_s29  }
0x118d PF: > { %p2420_p6 = scmp.ge.s32.totalorder %s2978_s23, 2  ;;  %s1892_s11 = sand.u32 1, %s2950_s16  }
0x118e   : > { %p3867_p12 = scmp.ne.s32.totalorder %s3837_s7, 0  ;;  %s1893_s20 = scalar_lea.sflag [#allocation4], %s1892_s11 }
0x1190   : > { %p2402_p10 = pnand %p2420_p6, %p3867_p12 }
0x1192   : > { %2933 = dma.done.wait (!%p2402_p10), %s1893_s20, 128  }
0x1193   : > { %2935 = vsyncadd (!%p2402_p10), %s1893_s20, 4294967168  ;;  %s36_s23 = sadd.s32 1, %s2978_s23   ;;  %s3868_s29 = smov %s2942_s30 }
0x1194   : > { %p33_p13 = scmp.ge.s32.totalorder %s36_s23, 6   ;;  %s3869_s30 = smov %s2946_s15 }
0x1195   : > { %s3870_s15 = smov %s3365_s19  ;;  %s3871_s16 = smov %s2954_s17 }
0x1196   : > { %s3872_s17 = smov %s2958_s18  ;;  %s3873_s18 = smov %s3368_s0 }
0x1197   : > { %s3874_s19 = smov %s2970_s21  ;;  %s3875_s20 = smov %s2974_s22 }
0x1198   : > { %s3876_s21 = smov %s3879_s2  ;;  %s3877_s22 = smov %s3883_s1 }
0x1199   :  { %35 = sbr.rel (!%p33_p13) target bundleno = 30 (0x1e), region = 162 }
0x11a0   :  { %1898 = vsyncpa [#allocation3], 1 }
0x11a1   :  { %1900 = vsyncpa [#allocation3 + $0x1], 1 }
0x11a2   :  { %1901 = vsyncpa [#allocation6], 1 }
0x11a3   :  { %1903 = vsyncpa [#allocation6 + $0x1], 1 }
0x11a4   :  { %1904 = vsyncpa [#allocation9], 1 }
0x11a5   :  { %1905 = vsyncpa [#allocation12], 1 }
0x11a6   :  { %1906 = vsyncpa [#allocation15], 1 }
0x11a7   :  { %1907 = vsyncpa [#allocation4], 1 }
0x11a8   :  { %1909 = vsyncpa [#allocation4 + $0x1], 1 }

</bundles_post_ra>
